<compile_context>
chip_gen: v5e
topology: v5e:2x2
jax: 0.10.0
libtpu: 0.0.40
codegen_flags: <defaults>
</compile_context>

<pallas_src>
import functools

import jax
import jax.numpy as jnp
from jax.experimental import pallas as pl
from jax.experimental.pallas import tpu as pltpu  # noqa: F401


# ------------------------------ kernel ------------------------------------- #

def _generator_kernel(noise_ref, fcw_ref, fcb_ref,
                      wc1_ref, bc1_ref, g1_ref, be1_ref,
                      wc2_ref, bc2_ref, g2_ref, be2_ref,
                      w3_ref, b3_ref, red_ref,
                      out_ref):
    eps = 1e-5
    B = noise_ref.shape[0]
    LH = fcw_ref.shape[1]
    H = g1_ref.shape[1]
    L = LH // H
    inv_n = 1.0 / (B * L)

    red = red_ref[...]                                    # (L*H, H) channel-sum

    # fc1 (columns pre-permuted -> result is already the flattened NLC layout)
    x = (jnp.dot(noise_ref[...], fcw_ref[...],
                 preferred_element_type=jnp.float32) + fcb_ref[...])   # (B, L*H)

    def conv_bn_relu(x, wc_ref, bc_ref, g_ref, be_ref):
        # Conv1d(k=5, pad=2) == a single banded matmul in the (B, L*H) layout.
        y = (jnp.dot(x, wc_ref[...], preferred_element_type=jnp.float32)
             + bc_ref[...])                                # (B, L*H)
        # Training-mode BatchNorm1d: per-channel stats over (batch, length),
        # one pass (E[x], E[x^2]); channel reduction via tiny matmuls.
        rows = jnp.sum(y, axis=0, keepdims=True)           # (1, L*H)
        rows_sq = jnp.sum(y * y, axis=0, keepdims=True)    # (1, L*H)
        mean = jnp.dot(rows, red, preferred_element_type=jnp.float32) * inv_n
        mean_sq = jnp.dot(rows_sq, red, preferred_element_type=jnp.float32) * inv_n
        var = mean_sq - mean * mean
        scale = g_ref[...] * jax.lax.rsqrt(var + eps)      # (1, H)
        shift = be_ref[...] - mean * scale                 # (1, H)
        scale_t = jnp.concatenate([scale] * L, axis=1)     # (1, L*H)
        shift_t = jnp.concatenate([shift] * L, axis=1)
        return jnp.maximum(y * scale_t + shift_t, 0.0)

    h = conv_bn_relu(x, wc1_ref, bc1_ref, g1_ref, be1_ref)
    h = conv_bn_relu(h, wc2_ref, bc2_ref, g2_ref, be2_ref)

    # 1x1 conv (block-diagonal matmul) + tanh, lane-dense (B, L*n_chars) store.
    out = (jnp.dot(h, w3_ref[...], preferred_element_type=jnp.float32)
           + b3_ref[...])
    out_ref[...] = jnp.tanh(out)


# -------------------- one-time parameter preprocessing --------------------- #

def prepare_params(params, *, hidden, seq_len, n_chars):
    """Hoisted weight preprocessing — call once at parameter-load time."""
    H, L = hidden, seq_len
    f32 = jnp.float32

    # fc1: permute output columns from (h*L + l) to (l*H + h), so the fc result
    # lands directly in the flattened NLC layout used inside the kernel.
    fc_w = params["fc_w"].reshape(128, H, L).transpose(0, 2, 1).reshape(128, L * H)
    fc_b = params["fc_b"].reshape(H, L).T.reshape(1, L * H)

    def band(w):
        # torch Conv1d weight (Cout, Cin, K) -> banded (L*Cin, L*Cout) matrix
        # implementing 'same' convolution with zero padding along L.
        K = w.shape[2]
        pad = (K - 1) // 2
        wt = jnp.transpose(w, (2, 1, 0)).astype(f32)       # (K, Cin, Cout)
        return sum(jnp.kron(jnp.eye(L, k=pad - k, dtype=f32), wt[k])
                   for k in range(K))

    def tile_bias(b):
        return jnp.tile(b.reshape(1, -1).astype(f32), (1, L))

    w3_2d = params["w3"][:, :, 0].T.astype(f32)            # (H, n_chars)
    return dict(
        fc_w=fc_w.astype(f32),
        fc_b=fc_b.astype(f32),
        wc1=band(params["w1"]), bc1=tile_bias(params["b1"]),
        g1=params["g1"].reshape(1, H).astype(f32),
        be1=params["be1"].reshape(1, H).astype(f32),
        wc2=band(params["w2"]), bc2=tile_bias(params["b2"]),
        g2=params["g2"].reshape(1, H).astype(f32),
        be2=params["be2"].reshape(1, H).astype(f32),
        w3=jnp.kron(jnp.eye(L, dtype=f32), w3_2d),         # block-diagonal 1x1 conv
        b3=tile_bias(params["b3"]),
        red=jnp.tile(jnp.eye(H, dtype=f32), (L, 1)),       # (L*H, H) channel-sum
    )


# ------------------------------ wrapper ------------------------------------ #

def generator_forward(noise, prep, *, hidden, seq_len, n_chars):
    B = noise.shape[0]
    H, L, C = hidden, seq_len, n_chars
    LH, LC = L * H, L * C

    def full(shape):
        return pl.BlockSpec(shape, lambda i, _s=shape: (0,) * len(_s))

    out_flat = pl.pallas_call(
        _generator_kernel,
        out_shape=jax.ShapeDtypeStruct((B, LC), jnp.float32),
        grid=(1,),
        in_specs=[
            full((B, 128)),
            full((128, LH)), full((1, LH)),
            full((LH, LH)), full((1, LH)), full((1, H)), full((1, H)),
            full((LH, LH)), full((1, LH)), full((1, H)), full((1, H)),
            full((LH, LC)), full((1, LC)),
            full((LH, H)),
        ],
        out_specs=full((B, LC)),
    )(noise, prep["fc_w"], prep["fc_b"],
      prep["wc1"], prep["bc1"], prep["g1"], prep["be1"],
      prep["wc2"], prep["bc2"], prep["g2"], prep["be2"],
      prep["w3"], prep["b3"], prep["red"])

    # (B, L*n_chars) -> (B, L, n_chars): contiguous reshape outside the kernel.
    return out_flat.reshape(B, L, C)


# ------------------------ pure-JAX reference ------------------------------- #

def reference_forward(noise, params, *, hidden, seq_len, n_chars):
    eps = 1e-5
    out = noise @ params["fc_w"] + params["fc_b"]
    x = out.reshape(-1, hidden, seq_len)                    # NCL

    def conv1d(x, w, b, pad):
        y = jax.lax.conv_general_dilated(
            x, w, window_strides=(1,), padding=[(pad, pad)],
            dimension_numbers=("NCH", "OIH", "NCH"))
        return y + b[None, :, None]

    def bn_relu(x, g, bt):
        mean = x.mean(axis=(0, 2), keepdims=True)
        var = ((x - mean) ** 2).mean(axis=(0, 2), keepdims=True)
        y = (x - mean) * jax.lax.rsqrt(var + eps)
        y = y * g[None, :, None] + bt[None, :, None]
        return jnp.maximum(y, 0.0)

    x = bn_relu(conv1d(x, params["w1"], params["b1"], 2), params["g1"], params["be1"])
    x = bn_relu(conv1d(x, params["w2"], params["b2"], 2), params["g2"], params["be2"])
    x = conv1d(x, params["w3"], params["b3"], 0)
    return jnp.tanh(x.transpose(0, 2, 1))


# ------------------------------- main -------------------------------------- #

if __name__ == "__main__":
    n_chars, seq_len, batch, hidden = 16, 8, 2, 32
    HL = hidden * seq_len

    key = jax.random.PRNGKey(0)
    ks = jax.random.split(key, 9)

    params = {
        "fc_w": 0.1 * jax.random.normal(ks[0], (128, HL), jnp.float32),
        "fc_b": 0.1 * jax.random.normal(ks[1], (HL,), jnp.float32),
        "w1": 0.1 * jax.random.normal(ks[2], (hidden, hidden, 5), jnp.float32),
        "b1": 0.1 * jax.random.normal(ks[3], (hidden,), jnp.float32),
        "g1": jnp.ones((hidden,), jnp.float32),
        "be1": jnp.zeros((hidden,), jnp.float32),
        "w2": 0.1 * jax.random.normal(ks[4], (hidden, hidden, 5), jnp.float32),
        "b2": 0.1 * jax.random.normal(ks[5], (hidden,), jnp.float32),
        "g2": jnp.ones((hidden,), jnp.float32),
        "be2": jnp.zeros((hidden,), jnp.float32),
        "w3": 0.1 * jax.random.normal(ks[6], (n_chars, hidden, 1), jnp.float32),
        "b3": 0.1 * jax.random.normal(ks[7], (n_chars,), jnp.float32),
    }
    noise = jax.random.normal(ks[8], (batch, 128), jnp.float32)

    # One-time (hoisted) weight preprocessing, then a single fused kernel call.
    prep = prepare_params(params, hidden=hidden, seq_len=seq_len, n_chars=n_chars)
    fwd = jax.jit(functools.partial(generator_forward, hidden=hidden,
                                    seq_len=seq_len, n_chars=n_chars))
    out = jax.block_until_ready(fwd(noise, prep))

    ref = reference_forward(noise, params, hidden=hidden, seq_len=seq_len,
                            n_chars=n_chars)

    assert out.shape == (batch, seq_len, n_chars), out.shape
    assert jnp.allclose(out, ref, atol=5e-4, rtol=5e-4), \
        float(jnp.max(jnp.abs(out - ref)))
    print("KERNEL_OK")
</pallas_src>

<mosaic_0001>
module attributes {stable_mosaic.version = 11 : i64} {
  func.func @_generator_kernel(%arg0: i32, %arg1: memref<2x128xf32, #tpu.memory_space<vmem>>, %arg2: memref<128x256xf32, #tpu.memory_space<vmem>>, %arg3: memref<1x256xf32, #tpu.memory_space<vmem>>, %arg4: memref<256x256xf32, #tpu.memory_space<vmem>>, %arg5: memref<1x256xf32, #tpu.memory_space<vmem>>, %arg6: memref<1x32xf32, #tpu.memory_space<vmem>>, %arg7: memref<1x32xf32, #tpu.memory_space<vmem>>, %arg8: memref<256x256xf32, #tpu.memory_space<vmem>>, %arg9: memref<1x256xf32, #tpu.memory_space<vmem>>, %arg10: memref<1x32xf32, #tpu.memory_space<vmem>>, %arg11: memref<1x32xf32, #tpu.memory_space<vmem>>, %arg12: memref<256x128xf32, #tpu.memory_space<vmem>>, %arg13: memref<1x128xf32, #tpu.memory_space<vmem>>, %arg14: memref<256x32xf32, #tpu.memory_space<vmem>>, %arg15: memref<2x128xf32, #tpu.memory_space<vmem>>) attributes {dimension_semantics = [#tpu.dimension_semantics<arbitrary>], iteration_bounds = array<i64: 1>, scalar_prefetch = 0 : i64, scratch_operands = 0 : i64, tpu.core_type = #tpu.core_type<tc>, window_params = [{pipeline_mode = #tpu.pipeline_mode<synchronous>, transform_indices = @transform_0, window_bounds = array<i64: 2, 128>}, {pipeline_mode = #tpu.pipeline_mode<synchronous>, transform_indices = @transform_1, window_bounds = array<i64: 128, 256>}, {pipeline_mode = #tpu.pipeline_mode<synchronous>, transform_indices = @transform_2, window_bounds = array<i64: 1, 256>}, {pipeline_mode = #tpu.pipeline_mode<synchronous>, transform_indices = @transform_3, window_bounds = array<i64: 256, 256>}, {pipeline_mode = #tpu.pipeline_mode<synchronous>, transform_indices = @transform_4, window_bounds = array<i64: 1, 256>}, {pipeline_mode = #tpu.pipeline_mode<synchronous>, transform_indices = @transform_5, window_bounds = array<i64: 1, 32>}, {pipeline_mode = #tpu.pipeline_mode<synchronous>, transform_indices = @transform_6, window_bounds = array<i64: 1, 32>}, {pipeline_mode = #tpu.pipeline_mode<synchronous>, transform_indices = @transform_7, window_bounds = array<i64: 256, 256>}, {pipeline_mode = #tpu.pipeline_mode<synchronous>, transform_indices = @transform_8, window_bounds = array<i64: 1, 256>}, {pipeline_mode = #tpu.pipeline_mode<synchronous>, transform_indices = @transform_9, window_bounds = array<i64: 1, 32>}, {pipeline_mode = #tpu.pipeline_mode<synchronous>, transform_indices = @transform_10, window_bounds = array<i64: 1, 32>}, {pipeline_mode = #tpu.pipeline_mode<synchronous>, transform_indices = @transform_11, window_bounds = array<i64: 256, 128>}, {pipeline_mode = #tpu.pipeline_mode<synchronous>, transform_indices = @transform_12, window_bounds = array<i64: 1, 128>}, {pipeline_mode = #tpu.pipeline_mode<synchronous>, transform_indices = @transform_13, window_bounds = array<i64: 256, 32>}, {pipeline_mode = #tpu.pipeline_mode<synchronous>, transform_indices = @transform_14, window_bounds = array<i64: 2, 128>}]} {
    %c0 = arith.constant 0 : index
    %c0_0 = arith.constant 0 : index
    %0 = vector.load %arg14[%c0, %c0_0] : memref<256x32xf32, #tpu.memory_space<vmem>>, vector<256x32xf32>
    %c0_1 = arith.constant 0 : index
    %c0_2 = arith.constant 0 : index
    %1 = vector.load %arg1[%c0_1, %c0_2] : memref<2x128xf32, #tpu.memory_space<vmem>>, vector<2x128xf32>
    %c0_3 = arith.constant 0 : index
    %c0_4 = arith.constant 0 : index
    %2 = vector.load %arg2[%c0_3, %c0_4] : memref<128x256xf32, #tpu.memory_space<vmem>>, vector<128x256xf32>
    %cst = arith.constant dense<0.000000e+00> : vector<2x256xf32>
    %3 = tpu.matmul %1, %2, %cst {dimension_numbers = #tpu.dot_dimension_numbers<[1], [0], [0], [1], [0, 0, 1, 1], [], []>} : vector<2x128xf32>, vector<128x256xf32>, vector<2x256xf32> -> vector<2x256xf32>
    %c0_5 = arith.constant 0 : index
    %c0_6 = arith.constant 0 : index
    %4 = vector.load %arg3[%c0_5, %c0_6] : memref<1x256xf32, #tpu.memory_space<vmem>>, vector<1x256xf32>
    %5 = vector.broadcast %4 : vector<1x256xf32> to vector<2x256xf32>
    %6 = arith.addf %3, %5 : vector<2x256xf32>
    %c0_7 = arith.constant 0 : index
    %c0_8 = arith.constant 0 : index
    %7 = vector.load %arg4[%c0_7, %c0_8] : memref<256x256xf32, #tpu.memory_space<vmem>>, vector<256x256xf32>
    %cst_9 = arith.constant dense<0.000000e+00> : vector<2x256xf32>
    %8 = tpu.matmul %6, %7, %cst_9 {dimension_numbers = #tpu.dot_dimension_numbers<[1], [0], [0], [1], [0, 0, 1, 1], [], []>} : vector<2x256xf32>, vector<256x256xf32>, vector<2x256xf32> -> vector<2x256xf32>
    %c0_10 = arith.constant 0 : index
    %c0_11 = arith.constant 0 : index
    %9 = vector.load %arg5[%c0_10, %c0_11] : memref<1x256xf32, #tpu.memory_space<vmem>>, vector<1x256xf32>
    %10 = vector.broadcast %9 : vector<1x256xf32> to vector<2x256xf32>
    %11 = arith.addf %8, %10 : vector<2x256xf32>
    %cst_12 = arith.constant dense<0.000000e+00> : vector<256xf32>
    %12 = vector.multi_reduction <add>, %11, %cst_12 [0] : vector<2x256xf32> to vector<256xf32>
    %13 = vector.shape_cast %12 : vector<256xf32> to vector<1x256xf32>
    %14 = arith.mulf %11, %11 : vector<2x256xf32>
    %cst_13 = arith.constant dense<0.000000e+00> : vector<256xf32>
    %15 = vector.multi_reduction <add>, %14, %cst_13 [0] : vector<2x256xf32> to vector<256xf32>
    %16 = vector.shape_cast %15 : vector<256xf32> to vector<1x256xf32>
    %cst_14 = arith.constant dense<0.000000e+00> : vector<1x32xf32>
    %17 = tpu.matmul %13, %0, %cst_14 {dimension_numbers = #tpu.dot_dimension_numbers<[1], [0], [0], [1], [0, 0, 1, 1], [], []>} : vector<1x256xf32>, vector<256x32xf32>, vector<1x32xf32> -> vector<1x32xf32>
    %cst_15 = arith.constant 6.250000e-02 : f32
    %18 = vector.broadcast %cst_15 : f32 to vector<1x32xf32>
    %19 = arith.mulf %17, %18 : vector<1x32xf32>
    %cst_16 = arith.constant dense<0.000000e+00> : vector<1x32xf32>
    %20 = tpu.matmul %16, %0, %cst_16 {dimension_numbers = #tpu.dot_dimension_numbers<[1], [0], [0], [1], [0, 0, 1, 1], [], []>} : vector<1x256xf32>, vector<256x32xf32>, vector<1x32xf32> -> vector<1x32xf32>
    %cst_17 = arith.constant 6.250000e-02 : f32
    %21 = vector.broadcast %cst_17 : f32 to vector<1x32xf32>
    %22 = arith.mulf %20, %21 : vector<1x32xf32>
    %23 = arith.mulf %19, %19 : vector<1x32xf32>
    %24 = arith.subf %22, %23 : vector<1x32xf32>
    %c0_18 = arith.constant 0 : index
    %c0_19 = arith.constant 0 : index
    %25 = vector.load %arg6[%c0_18, %c0_19] : memref<1x32xf32, #tpu.memory_space<vmem>>, vector<1x32xf32>
    %cst_20 = arith.constant 9.99999974E-6 : f32
    %26 = vector.broadcast %cst_20 : f32 to vector<1x32xf32>
    %27 = arith.addf %24, %26 : vector<1x32xf32>
    %28 = math.rsqrt %27 : vector<1x32xf32>
    %29 = arith.mulf %25, %28 : vector<1x32xf32>
    %c0_21 = arith.constant 0 : index
    %c0_22 = arith.constant 0 : index
    %30 = vector.load %arg7[%c0_21, %c0_22] : memref<1x32xf32, #tpu.memory_space<vmem>>, vector<1x32xf32>
    %31 = arith.mulf %19, %29 : vector<1x32xf32>
    %32 = arith.subf %30, %31 : vector<1x32xf32>
    %33 = tpu.concatenate %29, %29, %29, %29, %29, %29, %29, %29 in 1 : vector<1x32xf32>, vector<1x32xf32>, vector<1x32xf32>, vector<1x32xf32>, vector<1x32xf32>, vector<1x32xf32>, vector<1x32xf32>, vector<1x32xf32> -> vector<1x256xf32>
    %34 = tpu.concatenate %32, %32, %32, %32, %32, %32, %32, %32 in 1 : vector<1x32xf32>, vector<1x32xf32>, vector<1x32xf32>, vector<1x32xf32>, vector<1x32xf32>, vector<1x32xf32>, vector<1x32xf32>, vector<1x32xf32> -> vector<1x256xf32>
    %35 = vector.broadcast %33 : vector<1x256xf32> to vector<2x256xf32>
    %36 = arith.mulf %11, %35 : vector<2x256xf32>
    %37 = vector.broadcast %34 : vector<1x256xf32> to vector<2x256xf32>
    %38 = arith.addf %36, %37 : vector<2x256xf32>
    %cst_23 = arith.constant 0.000000e+00 : f32
    %39 = vector.broadcast %cst_23 : f32 to vector<2x256xf32>
    %40 = arith.maximumf %38, %39 : vector<2x256xf32>
    %c0_24 = arith.constant 0 : index
    %c0_25 = arith.constant 0 : index
    %41 = vector.load %arg8[%c0_24, %c0_25] : memref<256x256xf32, #tpu.memory_space<vmem>>, vector<256x256xf32>
    %cst_26 = arith.constant dense<0.000000e+00> : vector<2x256xf32>
    %42 = tpu.matmul %40, %41, %cst_26 {dimension_numbers = #tpu.dot_dimension_numbers<[1], [0], [0], [1], [0, 0, 1, 1], [], []>} : vector<2x256xf32>, vector<256x256xf32>, vector<2x256xf32> -> vector<2x256xf32>
    %c0_27 = arith.constant 0 : index
    %c0_28 = arith.constant 0 : index
    %43 = vector.load %arg9[%c0_27, %c0_28] : memref<1x256xf32, #tpu.memory_space<vmem>>, vector<1x256xf32>
    %44 = vector.broadcast %43 : vector<1x256xf32> to vector<2x256xf32>
    %45 = arith.addf %42, %44 : vector<2x256xf32>
    %cst_29 = arith.constant dense<0.000000e+00> : vector<256xf32>
    %46 = vector.multi_reduction <add>, %45, %cst_29 [0] : vector<2x256xf32> to vector<256xf32>
    %47 = vector.shape_cast %46 : vector<256xf32> to vector<1x256xf32>
    %48 = arith.mulf %45, %45 : vector<2x256xf32>
    %cst_30 = arith.constant dense<0.000000e+00> : vector<256xf32>
    %49 = vector.multi_reduction <add>, %48, %cst_30 [0] : vector<2x256xf32> to vector<256xf32>
    %50 = vector.shape_cast %49 : vector<256xf32> to vector<1x256xf32>
    %cst_31 = arith.constant dense<0.000000e+00> : vector<1x32xf32>
    %51 = tpu.matmul %47, %0, %cst_31 {dimension_numbers = #tpu.dot_dimension_numbers<[1], [0], [0], [1], [0, 0, 1, 1], [], []>} : vector<1x256xf32>, vector<256x32xf32>, vector<1x32xf32> -> vector<1x32xf32>
    %cst_32 = arith.constant 6.250000e-02 : f32
    %52 = vector.broadcast %cst_32 : f32 to vector<1x32xf32>
    %53 = arith.mulf %51, %52 : vector<1x32xf32>
    %cst_33 = arith.constant dense<0.000000e+00> : vector<1x32xf32>
    %54 = tpu.matmul %50, %0, %cst_33 {dimension_numbers = #tpu.dot_dimension_numbers<[1], [0], [0], [1], [0, 0, 1, 1], [], []>} : vector<1x256xf32>, vector<256x32xf32>, vector<1x32xf32> -> vector<1x32xf32>
    %cst_34 = arith.constant 6.250000e-02 : f32
    %55 = vector.broadcast %cst_34 : f32 to vector<1x32xf32>
    %56 = arith.mulf %54, %55 : vector<1x32xf32>
    %57 = arith.mulf %53, %53 : vector<1x32xf32>
    %58 = arith.subf %56, %57 : vector<1x32xf32>
    %c0_35 = arith.constant 0 : index
    %c0_36 = arith.constant 0 : index
    %59 = vector.load %arg10[%c0_35, %c0_36] : memref<1x32xf32, #tpu.memory_space<vmem>>, vector<1x32xf32>
    %cst_37 = arith.constant 9.99999974E-6 : f32
    %60 = vector.broadcast %cst_37 : f32 to vector<1x32xf32>
    %61 = arith.addf %58, %60 : vector<1x32xf32>
    %62 = math.rsqrt %61 : vector<1x32xf32>
    %63 = arith.mulf %59, %62 : vector<1x32xf32>
    %c0_38 = arith.constant 0 : index
    %c0_39 = arith.constant 0 : index
    %64 = vector.load %arg11[%c0_38, %c0_39] : memref<1x32xf32, #tpu.memory_space<vmem>>, vector<1x32xf32>
    %65 = arith.mulf %53, %63 : vector<1x32xf32>
    %66 = arith.subf %64, %65 : vector<1x32xf32>
    %67 = tpu.concatenate %63, %63, %63, %63, %63, %63, %63, %63 in 1 : vector<1x32xf32>, vector<1x32xf32>, vector<1x32xf32>, vector<1x32xf32>, vector<1x32xf32>, vector<1x32xf32>, vector<1x32xf32>, vector<1x32xf32> -> vector<1x256xf32>
    %68 = tpu.concatenate %66, %66, %66, %66, %66, %66, %66, %66 in 1 : vector<1x32xf32>, vector<1x32xf32>, vector<1x32xf32>, vector<1x32xf32>, vector<1x32xf32>, vector<1x32xf32>, vector<1x32xf32>, vector<1x32xf32> -> vector<1x256xf32>
    %69 = vector.broadcast %67 : vector<1x256xf32> to vector<2x256xf32>
    %70 = arith.mulf %45, %69 : vector<2x256xf32>
    %71 = vector.broadcast %68 : vector<1x256xf32> to vector<2x256xf32>
    %72 = arith.addf %70, %71 : vector<2x256xf32>
    %cst_40 = arith.constant 0.000000e+00 : f32
    %73 = vector.broadcast %cst_40 : f32 to vector<2x256xf32>
    %74 = arith.maximumf %72, %73 : vector<2x256xf32>
    %c0_41 = arith.constant 0 : index
    %c0_42 = arith.constant 0 : index
    %75 = vector.load %arg12[%c0_41, %c0_42] : memref<256x128xf32, #tpu.memory_space<vmem>>, vector<256x128xf32>
    %cst_43 = arith.constant dense<0.000000e+00> : vector<2x128xf32>
    %76 = tpu.matmul %74, %75, %cst_43 {dimension_numbers = #tpu.dot_dimension_numbers<[1], [0], [0], [1], [0, 0, 1, 1], [], []>} : vector<2x256xf32>, vector<256x128xf32>, vector<2x128xf32> -> vector<2x128xf32>
    %c0_44 = arith.constant 0 : index
    %c0_45 = arith.constant 0 : index
    %77 = vector.load %arg13[%c0_44, %c0_45] : memref<1x128xf32, #tpu.memory_space<vmem>>, vector<1x128xf32>
    %78 = vector.broadcast %77 : vector<1x128xf32> to vector<2x128xf32>
    %79 = arith.addf %76, %78 : vector<2x128xf32>
    %80 = math.tanh %79 : vector<2x128xf32>
    %c0_46 = arith.constant 0 : index
    %c0_47 = arith.constant 0 : index
    %81 = vector.load %arg15[%c0_46, %c0_47] : memref<2x128xf32, #tpu.memory_space<vmem>>, vector<2x128xf32>
    tpu.vector_store %arg15[%c0_46, %c0_47], %80 {strides = array<i32>} : memref<2x128xf32, #tpu.memory_space<vmem>>, vector<2x128xf32>,
    return
  }
  func.func @transform_0(%arg0: i32) -> (i32, i32) {
    %c0_i32 = arith.constant 0 : i32
    %c0_i32_0 = arith.constant 0 : i32
    %c0_i32_1 = arith.constant 0 : i32
    return %c0_i32, %c0_i32_0 : i32, i32
  }
  func.func @transform_1(%arg0: i32) -> (i32, i32) {
    %c0_i32 = arith.constant 0 : i32
    %c0_i32_0 = arith.constant 0 : i32
    %c0_i32_1 = arith.constant 0 : i32
    return %c0_i32, %c0_i32_0 : i32, i32
  }
  func.func @transform_2(%arg0: i32) -> (i32, i32) {
    %c0_i32 = arith.constant 0 : i32
    %c0_i32_0 = arith.constant 0 : i32
    %c0_i32_1 = arith.constant 0 : i32
    return %c0_i32, %c0_i32_0 : i32, i32
  }
  func.func @transform_3(%arg0: i32) -> (i32, i32) {
    %c0_i32 = arith.constant 0 : i32
    %c0_i32_0 = arith.constant 0 : i32
    %c0_i32_1 = arith.constant 0 : i32
    return %c0_i32, %c0_i32_0 : i32, i32
  }
  func.func @transform_4(%arg0: i32) -> (i32, i32) {
    %c0_i32 = arith.constant 0 : i32
    %c0_i32_0 = arith.constant 0 : i32
    %c0_i32_1 = arith.constant 0 : i32
    return %c0_i32, %c0_i32_0 : i32, i32
  }
  func.func @transform_5(%arg0: i32) -> (i32, i32) {
    %c0_i32 = arith.constant 0 : i32
    %c0_i32_0 = arith.constant 0 : i32
    %c0_i32_1 = arith.constant 0 : i32
    return %c0_i32, %c0_i32_0 : i32, i32
  }
  func.func @transform_6(%arg0: i32) -> (i32, i32) {
    %c0_i32 = arith.constant 0 : i32
    %c0_i32_0 = arith.constant 0 : i32
    %c0_i32_1 = arith.constant 0 : i32
    return %c0_i32, %c0_i32_0 : i32, i32
  }
  func.func @transform_7(%arg0: i32) -> (i32, i32) {
    %c0_i32 = arith.constant 0 : i32
    %c0_i32_0 = arith.constant 0 : i32
    %c0_i32_1 = arith.constant 0 : i32
    return %c0_i32, %c0_i32_0 : i32, i32
  }
  func.func @transform_8(%arg0: i32) -> (i32, i32) {
    %c0_i32 = arith.constant 0 : i32
    %c0_i32_0 = arith.constant 0 : i32
    %c0_i32_1 = arith.constant 0 : i32
    return %c0_i32, %c0_i32_0 : i32, i32
  }
  func.func @transform_9(%arg0: i32) -> (i32, i32) {
    %c0_i32 = arith.constant 0 : i32
    %c0_i32_0 = arith.constant 0 : i32
    %c0_i32_1 = arith.constant 0 : i32
    return %c0_i32, %c0_i32_0 : i32, i32
  }
  func.func @transform_10(%arg0: i32) -> (i32, i32) {
    %c0_i32 = arith.constant 0 : i32
    %c0_i32_0 = arith.constant 0 : i32
    %c0_i32_1 = arith.constant 0 : i32
    return %c0_i32, %c0_i32_0 : i32, i32
  }
  func.func @transform_11(%arg0: i32) -> (i32, i32) {
    %c0_i32 = arith.constant 0 : i32
    %c0_i32_0 = arith.constant 0 : i32
    %c0_i32_1 = arith.constant 0 : i32
    return %c0_i32, %c0_i32_0 : i32, i32
  }
  func.func @transform_12(%arg0: i32) -> (i32, i32) {
    %c0_i32 = arith.constant 0 : i32
    %c0_i32_0 = arith.constant 0 : i32
    %c0_i32_1 = arith.constant 0 : i32
    return %c0_i32, %c0_i32_0 : i32, i32
  }
  func.func @transform_13(%arg0: i32) -> (i32, i32) {
    %c0_i32 = arith.constant 0 : i32
    %c0_i32_0 = arith.constant 0 : i32
    %c0_i32_1 = arith.constant 0 : i32
    return %c0_i32, %c0_i32_0 : i32, i32
  }
  func.func @transform_14(%arg0: i32) -> (i32, i32) {
    %c0_i32 = arith.constant 0 : i32
    %c0_i32_0 = arith.constant 0 : i32
    %c0_i32_1 = arith.constant 0 : i32
    return %c0_i32, %c0_i32_0 : i32, i32
  }
}

</mosaic_0001>

<bundles_post_ra>
// kernel: generator_forward.1
= control target key start
LH: loop header
LB: loop body
LE: loop exit
PB: predicated region body
PF: predicated region fallthrough
CT: control target
= control target key end

     0   :  { %19 = vsyncpa [#allocation3], 0  ;;  %s1600_s0 = inlined_call_operand.vmem [shape: f32[2,128], index: 0, kind: input, shape index: {}]   ;;  %s1601_s1 = inlined_call_operand.vmem [shape: f32[128,256], index: 1, kind: input, shape index: {}]   ;;  %s1602_s2 = inlined_call_operand.vmem [shape: f32[1,256], index: 2, kind: input, shape index: {}]   ;;  %s1603_s3 = inlined_call_operand.hbm [shape: f32[256,256], index: 3, kind: input, shape index: {}]   ;;  %s1604_s4 = inlined_call_operand.vmem [shape: f32[1,256], index: 4, kind: input, shape index: {}]   ;;  %s1605_s5 = inlined_call_operand.vmem [shape: f32[1,32], index: 5, kind: input, shape index: {}]   ;;  %s1606_s6 = inlined_call_operand.vmem [shape: f32[1,32], index: 6, kind: input, shape index: {}]   ;;  %s1607_s7 = inlined_call_operand.hbm [shape: f32[256,256], index: 7, kind: input, shape index: {}]   ;;  %s1608_s8 = inlined_call_operand.vmem [shape: f32[1,256], index: 8, kind: input, shape index: {}]   ;;  %s1609_s9 = inlined_call_operand.vmem [shape: f32[1,32], index: 9, kind: input, shape index: {}]   ;;  %s1610_s10 = inlined_call_operand.vmem [shape: f32[1,32], index: 10, kind: input, shape index: {}]   ;;  %s1611_s11 = inlined_call_operand.hbm [shape: f32[256,128], index: 11, kind: input, shape index: {}]   ;;  %s1612_s12 = inlined_call_operand.vmem [shape: f32[1,128], index: 12, kind: input, shape index: {}]   ;;  %s1613_s13 = inlined_call_operand.vmem [shape: f32[256,32], index: 13, kind: input, shape index: {}]   ;;  %s1614_s14 = inlined_call_operand.vmem [shape: f32[2,128], index: 14, kind: output, shape index: {}]  }
   0x1   :  { %20 = vsyncpa [#allocation5], 0  ;;  %s50_s15 = sshll.u32 %s1607_s7, 4  ;;  %s1018_s16 = smov [#allocation4]   ;;  %s51_s15 = int_to_ptr.hbm [resolvable:$true] %s50_s15 }
   0x2   :  { %s52_s17 = sshll.u32 %s1018_s16, 4  ;;  %s31_s20 = sshll.u32 %s1603_s3, 4  ;;  %s53_s17 = int_to_ptr.vmem [resolvable:$true] %s52_s17  ;;  %s32_s20 = int_to_ptr.hbm [resolvable:$true] %s31_s20 }
   0x3   :  { %s1019_s21 = smov 256   ;;  %s1020_s22 = smov 16  }
   0x4   :  { %58 = dma.hbm_to_vmem [thread:$0]  %s51_s15, 8192, %s53_s17, [#allocation5], %s1019_s21, %s1019_s21, %s1020_s22  }
   0x5   :  { %s1021_s23 = smov [#allocation2]   ;;  %s69_s27 = sshll.u32 %s1611_s11, 4  ;;  %s70_s27 = int_to_ptr.hbm [resolvable:$true] %s69_s27 }
   0x6   :  { %s33_s24 = sshll.u32 %s1021_s23, 4  ;;  %s1022_s7 = smov [#allocation6]   ;;  %s34_s24 = int_to_ptr.vmem [resolvable:$true] %s33_s24 }
   0x7   :  { %39 = dma.hbm_to_vmem [thread:$0]  %s32_s20, 8192, %s34_s24, [#allocation3], %s1019_s21, %s1019_s21, %s1020_s22  }
   0x8   :  { %s71_s28 = sshll.u32 %s1022_s7, 4  ;;  %s1023_s29 = smov 128   ;;  %s72_s28 = int_to_ptr.vmem [resolvable:$true] %s71_s28 }
   0x9   :  { %s1024_s30 = smov 8  }
   0xa   :  { %77 = dma.hbm_to_vmem [thread:$0]  %s70_s27, 4096, %s72_s28, [#allocation5], %s1023_s29, %s1023_s29, %s1024_s30  }
   0xb   :  { %1014 = dma.done.wait [#allocation3], 8192  }
   0xc   :  { %1015 = vsyncadd [#allocation3], 4294959104 }
   0xd   :  { %1016 = dma.done.wait [#allocation5], 12288  }
   0xe   :  { %1017 = vsyncadd [#allocation5], 4294955008  ;;  %v157_v0 = vld [vmem:[%s1601_s1 + $0xf0] sm:$0xff]  ;;  %v155_v1 = vld [vmem:[%s1601_s1 + $0xe0] sm:$0xff]  ;;  %vm355_vm0 = vcmask 1041408   ;;  %s1025_s25 = smov 96  }
   0xf   :  { %v158_v2 = vld [vmem:[%s1601_s1 + $0xf8] sm:$0xff]  ;;  %165 = vmatpush.msra.mxu0 %v157_v0  ;;  %v156_v3 = vld [vmem:[%s1601_s1 + $0xe8] sm:$0xff]  ;;  %v153_v4 = vld [vmem:[%s1601_s1 + $0xd0] sm:$0xff]  ;;  %s1027_s26 = smov 64   ;;  %vm497_vm4 = vcmask 261120   ;;  %vm499_vm5 = vcmask 523264  }
  0x10   :  { %185 = vmatpush.msra.mxu1 %v158_v2  ;;  %v154_v5 = vld [vmem:[%s1601_s1 + $0xd8] sm:$0xff]  ;;  %v151_v6 = vld [vmem:[%s1601_s1 + $0xc0] sm:$0xff]  ;;  %v152_v7 = vld [vmem:[%s1601_s1 + $0xc8] sm:$0xff]  ;;  %vm501_vm6 = vcmask 785408  }
  0x11   :  { %166 = vmatpush.msra.mxu0 %v155_v1  ;;  %v149_v8 = vld [vmem:[%s1601_s1 + $0xb0] sm:$0xff]  ;;  %v150_v9 = vld [vmem:[%s1601_s1 + $0xb8] sm:$0xff]  ;;  %v147_v10 = vld [vmem:[%s1601_s1 + $0xa0] sm:$0xff] }
  0x12   :  { %186 = vmatpush.msra.mxu1 %v156_v3  ;;  %v148_v11 = vld [vmem:[%s1601_s1 + $0xa8] sm:$0xff]  ;;  %v145_v12 = vld [vmem:[%s1601_s1 + $0x90] sm:$0xff]  ;;  %v146_v13 = vld [vmem:[%s1601_s1 + $0x98] sm:$0xff] }
  0x13   :  { %167 = vmatpush.msra.mxu0 %v153_v4  ;;  %v235_v14 = vld [vmem:[#allocation2 + $0xf0] sm:$0xff]  ;;  %v233_v15 = vld [vmem:[#allocation2 + $0xe0] sm:$0xff]  ;;  %v144_v17 = vld [vmem:[%s1601_s1 + $0x88] sm:$0xff] }
  0x14   :  { %187 = vmatpush.msra.mxu1 %v154_v5  ;;  %v143_v16 = vld [vmem:[%s1601_s1 + $0x80] sm:$0xff]  ;;  %275 = vmatpush.msra.mxu2 %v235_v14  ;;  %v267_v18 = vld [vmem:[#allocation2 + $0x1f0] sm:$0xff]  ;;  %v142_v22 = vld [vmem:[%s1601_s1 + $0x78] sm:$0xff] }
  0x15   :  { %168 = vmatpush.msra.mxu0 %v151_v6  ;;  %v231_v19 = vld [vmem:[#allocation2 + $0xd0] sm:$0xff]  ;;  %v265_v20 = vld [vmem:[#allocation2 + $0x1e0] sm:$0xff]  ;;  %295 = vmatpush.msra.mxu3 %v267_v18  ;;  %v140_v26 = vld [vmem:[%s1601_s1 + $0x68] sm:$0xff] }
  0x16   :  { %188 = vmatpush.msra.mxu1 %v152_v7  ;;  %v141_v21 = vld [vmem:[%s1601_s1 + $0x70] sm:$0xff]  ;;  %276 = vmatpush.msra.mxu2 %v233_v15  ;;  %v229_v23 = vld [vmem:[#allocation2 + $0xc0] sm:$0xff]  ;;  %v138_v30 = vld [vmem:[%s1601_s1 + $0x58] sm:$0xff] }
  0x17   :  { %169 = vmatpush.msra.mxu0 %v149_v8  ;;  %v263_v24 = vld [vmem:[#allocation2 + $0x1d0] sm:$0xff]  ;;  %v139_v25 = vld [vmem:[%s1601_s1 + $0x60] sm:$0xff]  ;;  %296 = vmatpush.msra.mxu3 %v265_v20  ;;  %v136_v34 = vld [vmem:[%s1601_s1 + $0x48] sm:$0xff] }
  0x18   :  { %189 = vmatpush.msra.mxu1 %v150_v9  ;;  %277 = vmatpush.msra.mxu2 %v231_v19  ;;  %v227_v27 = vld [vmem:[#allocation2 + $0xb0] sm:$0xff]  ;;  %v261_v28 = vld [vmem:[#allocation2 + $0x1c0] sm:$0xff]  ;;  %v134_v38 = vld [vmem:[%s1601_s1 + $0x38] sm:$0xff] }
  0x19   :  { %170 = vmatpush.msra.mxu0 %v147_v10  ;;  %v137_v29 = vld [vmem:[%s1601_s1 + $0x50] sm:$0xff]  ;;  %297 = vmatpush.msra.mxu3 %v263_v24  ;;  %v225_v31 = vld [vmem:[#allocation2 + $0xa0] sm:$0xff]  ;;  %v132_v42 = vld [vmem:[%s1601_s1 + $0x28] sm:$0xff] }
  0x1a   :  { %190 = vmatpush.msra.mxu1 %v148_v11  ;;  %278 = vmatpush.msra.mxu2 %v229_v23  ;;  %v259_v32 = vld [vmem:[#allocation2 + $0x1b0] sm:$0xff]  ;;  %v135_v33 = vld [vmem:[%s1601_s1 + $0x40] sm:$0xff]  ;;  %v130_v46 = vld [vmem:[%s1601_s1 + $0x18] sm:$0xff] }
  0x1b   :  { %171 = vmatpush.msra.mxu0 %v145_v12  ;;  %298 = vmatpush.msra.mxu3 %v261_v28  ;;  %v223_v35 = vld [vmem:[#allocation2 + $0x90] sm:$0xff]  ;;  %v257_v36 = vld [vmem:[#allocation2 + $0x1a0] sm:$0xff]  ;;  %v128_v50 = vld [vmem:[%s1601_s1 + $0x8] sm:$0xff] }
  0x1c   :  { %191 = vmatpush.msra.mxu1 %v146_v13  ;;  %279 = vmatpush.msra.mxu2 %v227_v27  ;;  %v133_v37 = vld [vmem:[%s1601_s1 + $0x30] sm:$0xff]  ;;  %v221_v39 = vld [vmem:[#allocation2 + $0x80] sm:$0xff]  ;;  %v236_v52 = vld [vmem:[#allocation2 + $0xf8] sm:$0xff] }
  0x1d   :  { %172 = vmatpush.msra.mxu0 %v143_v16  ;;  %299 = vmatpush.msra.mxu3 %v259_v32  ;;  %v255_v40 = vld [vmem:[#allocation2 + $0x190] sm:$0xff]  ;;  %v131_v41 = vld [vmem:[%s1601_s1 + $0x20] sm:$0xff]  ;;  %v268_v53 = vld [vmem:[#allocation2 + $0x1f8] sm:$0xff] }
  0x1e   :  { %192 = vmatpush.msra.mxu1 %v144_v17  ;;  %280 = vmatpush.msra.mxu2 %v225_v31  ;;  %v219_v43 = vld [vmem:[#allocation2 + $0x70] sm:$0xff]  ;;  %v253_v44 = vld [vmem:[#allocation2 + $0x180] sm:$0xff]  ;;  %v234_v56 = vld [vmem:[#allocation2 + $0xe8] sm:$0xff] }
  0x1f   :  { %173 = vmatpush.msra.mxu0 %v141_v21  ;;  %300 = vmatpush.msra.mxu3 %v257_v36  ;;  %v129_v45 = vld [vmem:[%s1601_s1 + $0x10] sm:$0xff]  ;;  %v217_v47 = vld [vmem:[#allocation2 + $0x60] sm:$0xff]  ;;  %v266_v57 = vld [vmem:[#allocation2 + $0x1e8] sm:$0xff] }
  0x20   :  { %193 = vmatpush.msra.mxu1 %v142_v22  ;;  %281 = vmatpush.msra.mxu2 %v223_v35  ;;  %v251_v48 = vld [vmem:[#allocation2 + $0x170] sm:$0xff]  ;;  %v127_v49 = vld [vmem:[%s1601_s1] sm:$0xff]  ;;  %v232_v60 = vld [vmem:[#allocation2 + $0xd8] sm:$0xff] }
  0x21   :  { %174 = vmatpush.msra.mxu0 %v139_v25  ;;  %301 = vmatpush.msra.mxu3 %v255_v40  ;;  %v126_v51 = vld [vmem:[%s1600_s0] sm:$0x3]  ;;  %v215_v54 = vld [vmem:[#allocation2 + $0x50] sm:$0xff]  ;;  %v264_v61 = vld [vmem:[#allocation2 + $0x1d8] sm:$0xff] }
  0x22   :  { %194 = vmatpush.msra.mxu1 %v140_v26  ;;  %282 = vmatpush.msra.mxu2 %v221_v39  ;;  %v249_v55 = vld [vmem:[#allocation2 + $0x160] sm:$0xff]  ;;  %v247_v59 = vld [vmem:[#allocation2 + $0x150] sm:$0xff]  ;;  %v230_v0 = vld [vmem:[#allocation2 + $0xc8] sm:$0xff] }
  0x23   :  { %175 = vmatpush.msra.mxu0 %v137_v29  ;;  %302 = vmatpush.msra.mxu3 %v253_v44  ;;  %v213_v58 = vld [vmem:[#allocation2 + $0x40] sm:$0xff]  ;;  %v211_v62 = vld [vmem:[#allocation2 + $0x30] sm:$0xff]  ;;  %v262_v1 = vld [vmem:[#allocation2 + $0x1c8] sm:$0xff] }
  0x24   :  { %195 = vmatpush.msra.mxu1 %v138_v30  ;;  %283 = vmatpush.msra.mxu2 %v219_v43  ;;  %v245_v63 = vld [vmem:[#allocation2 + $0x140] sm:$0xff]  ;;  %v243_v3 = vld [vmem:[#allocation2 + $0x130] sm:$0xff]  ;;  %v228_v4 = vld [vmem:[#allocation2 + $0xb8] sm:$0xff] }
  0x25   :  { %176 = vmatpush.msra.mxu0 %v135_v33  ;;  %303 = vmatpush.msra.mxu3 %v251_v48  ;;  %v209_v2 = vld [vmem:[#allocation2 + $0x20] sm:$0xff]  ;;  %v260_v5 = vld [vmem:[#allocation2 + $0x1b8] sm:$0xff]  ;;  %v226_v6 = vld [vmem:[#allocation2 + $0xa8] sm:$0xff] }
  0x26   :  { %196 = vmatpush.msra.mxu1 %v136_v34  ;;  %284 = vmatpush.msra.mxu2 %v217_v47  ;;  %v258_v7 = vld [vmem:[#allocation2 + $0x1a8] sm:$0xff]  ;;  %v224_v8 = vld [vmem:[#allocation2 + $0x98] sm:$0xff]  ;;  %v207_v23 = vld [vmem:[#allocation2 + $0x10] sm:$0xff] }
  0x27   :  { %177 = vmatpush.msra.mxu0 %v133_v37  ;;  %304 = vmatpush.msra.mxu3 %v249_v55  ;;  %v256_v9 = vld [vmem:[#allocation2 + $0x198] sm:$0xff]  ;;  %v222_v10 = vld [vmem:[#allocation2 + $0x88] sm:$0xff]  ;;  %v241_v24 = vld [vmem:[#allocation2 + $0x120] sm:$0xff] }
  0x28   :  { %197 = vmatpush.msra.mxu1 %v134_v38  ;;  %285 = vmatpush.msra.mxu2 %v215_v54  ;;  %v254_v11 = vld [vmem:[#allocation2 + $0x188] sm:$0xff]  ;;  %v220_v12 = vld [vmem:[#allocation2 + $0x78] sm:$0xff]  ;;  %v205_v27 = vld [vmem:[#allocation2] sm:$0xff] }
  0x29   :  { %178 = vmatpush.msra.mxu0 %v131_v41  ;;  %305 = vmatpush.msra.mxu3 %v247_v59  ;;  %v252_v13 = vld [vmem:[#allocation2 + $0x178] sm:$0xff]  ;;  %v218_v14 = vld [vmem:[#allocation2 + $0x68] sm:$0xff]  ;;  %v239_v28 = vld [vmem:[#allocation2 + $0x110] sm:$0xff] }
  0x2a   :  { %198 = vmatpush.msra.mxu1 %v132_v42  ;;  %286 = vmatpush.msra.mxu2 %v213_v58  ;;  %v250_v15 = vld [vmem:[#allocation2 + $0x168] sm:$0xff]  ;;  %v216_v16 = vld [vmem:[#allocation2 + $0x58] sm:$0xff]  ;;  %v237_v31 = vld [vmem:[#allocation2 + $0x100] sm:$0xff] }
  0x2b   :  { %179 = vmatpush.msra.mxu0 %v129_v45  ;;  %306 = vmatpush.msra.mxu3 %v245_v63  ;;  %v248_v17 = vld [vmem:[#allocation2 + $0x158] sm:$0xff]  ;;  %v214_v18 = vld [vmem:[#allocation2 + $0x48] sm:$0xff]  ;;  %v1219_v34 = vld [vmem:[%s1613_s13 + $0xf0] sm:$0xff] }
  0x2c   :  { %199 = vmatpush.msra.mxu1 %v130_v46  ;;  %287 = vmatpush.msra.mxu2 %v211_v62  ;;  %v246_v19 = vld [vmem:[#allocation2 + $0x148] sm:$0xff]  ;;  %v212_v20 = vld [vmem:[#allocation2 + $0x38] sm:$0xff]  ;;  %v1230_v36 = vld [vmem:[%s1613_s13 + $0x70] sm:$0xff] }
  0x2d   :  { %180 = vmatpush.msra.mxu0 %v127_v49  ;;  %307 = vmatpush.msra.mxu3 %v243_v3  ;;  %v244_v21 = vld [vmem:[#allocation2 + $0x138] sm:$0xff]  ;;  %v210_v22 = vld [vmem:[#allocation2 + $0x28] sm:$0xff]  ;;  %v1250_v39 = vld [vmem:[%s1613_s13 + $0xe0] sm:$0xff] }
  0x2e   :  { %200 = vmatpush.msra.mxu1 %v128_v50  ;;  %181 = vmatmul.f32.vlgmr.msra.gmra.mxu0 %v126_v51  ;;  %v208_v25 = vld [vmem:[#allocation2 + $0x18] sm:$0xff]  ;;  %v242_v26 = vld [vmem:[#allocation2 + $0x128] sm:$0xff]  ;;  %v1258_v40 = vld [vmem:[%s1613_s13 + $0x60] sm:$0xff] }
  0x2f   :  { %201 = vmatmul.f32.vlgmr.msra.gmra.mxu1 %v126_v51  ;;  %315 = vmatpush.msrb.mxu0 %v236_v52  ;;  %v206_v29 = vld [vmem:[#allocation2 + $0x8] sm:$0xff]  ;;  %v240_v30 = vld [vmem:[#allocation2 + $0x118] sm:$0xff]  ;;  %v1273_v42 = vld [vmem:[%s1613_s13 + $0xd0] sm:$0xff] }
  0x30   :  { %335 = vmatpush.msrb.mxu1 %v268_v53  ;;  %288 = vmatpush.msra.mxu2 %v209_v2  ;;  %v238_v32 = vld [vmem:[#allocation2 + $0x108] sm:$0xff]  ;;  %v1214_v33 = vld [vmem:[%s1613_s13 + $0xf8] sm:$0xff]  ;;  %v159_v44 = vld [vmem:[%s1602_s2] sm:$0x3] }
  0x31   :  { %316 = vmatpush.msrb.mxu0 %v234_v56  ;;  %308 = vmatpush.msra.mxu3 %v241_v24  ;;  %v1225_v35 = vld [vmem:[%s1613_s13 + $0x78] sm:$0xff]  ;;  %v1236_v37 = vld [vmem:[%s1613_s13 + $0xe8] sm:$0xff]  ;;  %v161_v45 = vperm.slane %v159_v44, 0  ;;  %v162_v46 = vperm.slane %v159_v44, 1  ;;  %v1299_v52 = vld [vmem:[%s1613_s13 + $0xc0] sm:$0xff] }
  0x32   :  { %336 = vmatpush.msrb.mxu1 %v266_v57  ;;  %289 = vmatpush.msra.mxu2 %v207_v23  ;;  %v1244_v38 = vld [vmem:[%s1613_s13 + $0x68] sm:$0xff]  ;;  %v1264_v41 = vld [vmem:[%s1613_s13 + $0xd8] sm:$0xff]  ;;  %v1306_v53 = vld [vmem:[%s1613_s13 + $0x50] sm:$0xff] }
  0x33   :  { %317 = vmatpush.msrb.mxu0 %v232_v60  ;;  %309 = vmatpush.msra.mxu3 %v239_v28  ;;  %v1282_v43 = vld [vmem:[%s1613_s13 + $0xc8] sm:$0xff]  ;;  %v1294_v51 = vld [vmem:[%s1613_s13 + $0x58] sm:$0xff]  ;;  %v1325_v56 = vld [vmem:[%s1613_s13 + $0xb0] sm:$0xff] }
  0x34   :  { %337 = vmatpush.msrb.mxu1 %v264_v61  ;;  %290 = vmatpush.msra.mxu2 %v205_v27  ;;  %v1311_v54 = vld [vmem:[%s1613_s13 + $0xb8] sm:$0xff]  ;;  %v1320_v55 = vld [vmem:[%s1613_s13 + $0x48] sm:$0xff]  ;;  %v1334_v57 = vld [vmem:[%s1613_s13 + $0x40] sm:$0xff] }
  0x35   :  { %318 = vmatpush.msrb.mxu0 %v230_v0  ;;  %310 = vmatpush.msra.mxu3 %v237_v31  ;;  %v1339_v58 = vld [vmem:[%s1613_s13 + $0xa8] sm:$0xff]  ;;  %v1348_v59 = vld [vmem:[%s1613_s13 + $0x38] sm:$0xff]  ;;  %v1353_v60 = vld [vmem:[%s1613_s13 + $0xa0] sm:$0xff] }
  0x36   :  { %338 = vmatpush.msrb.mxu1 %v262_v1  ;;  %386 = vmatpush.msrb.mxu2 %v1225_v35  ;;  %v1362_v61 = vld [vmem:[%s1613_s13 + $0x30] sm:$0xff]  ;;  %v1367_v62 = vld [vmem:[%s1613_s13 + $0x98] sm:$0xff]  ;;  %v1376_v63 = vld [vmem:[%s1613_s13 + $0x28] sm:$0xff] }
  0x37   :  { %319 = vmatpush.msrb.mxu0 %v228_v4  ;;  %406 = vmatpush.msrb.mxu3 %v1214_v33  ;;  %v1381_v0 = vld [vmem:[%s1613_s13 + $0x90] sm:$0xff]  ;;  %v1390_v1 = vld [vmem:[%s1613_s13 + $0x20] sm:$0xff]  ;;  %v1395_v2 = vld [vmem:[%s1613_s13 + $0x88] sm:$0xff] }
  0x38   :  { %339 = vmatpush.msrb.mxu1 %v260_v5  ;;  %387 = vmatpush.msrb.mxu2 %v1230_v36  ;;  %v1404_v3 = vld [vmem:[%s1613_s13 + $0x18] sm:$0xff]  ;;  %v1409_v4 = vld [vmem:[%s1613_s13 + $0x80] sm:$0xff]  ;;  %v1418_v5 = vld [vmem:[%s1613_s13 + $0x10] sm:$0xff] }
  0x39   :  { %320 = vmatpush.msrb.mxu0 %v226_v6  ;;  %407 = vmatpush.msrb.mxu3 %v1219_v34  ;;  %v1426_v6 = vld [vmem:[%s1613_s13 + $0x8] sm:$0xff] }
  0x3a   :  { %340 = vmatpush.msrb.mxu1 %v258_v7  ;;  %388 = vmatpush.msrb.mxu2 %v1244_v38  ;;  %v1432_v7 = vld [vmem:[%s1613_s13] sm:$0xff] }
  0x3b   :  { %321 = vmatpush.msrb.mxu0 %v224_v8  ;;  %408 = vmatpush.msrb.mxu3 %v1236_v37  ;;  %v269_v8 = vld [vmem:[%s1604_s4] sm:$0x3] }
  0x3c   :  { %341 = vmatpush.msrb.mxu1 %v256_v9  ;;  %389 = vmatpush.msrb.mxu2 %v1258_v40  ;;  %v272_v9 = vperm.slane %v269_v8, 1 }
  0x3d   :  { %322 = vmatpush.msrb.mxu0 %v222_v10  ;;  %409 = vmatpush.msrb.mxu3 %v1250_v39 }
  0x3e   :  { %342 = vmatpush.msrb.mxu1 %v254_v11  ;;  %390 = vmatpush.msrb.mxu2 %v1294_v51 }
  0x3f   :  { %323 = vmatpush.msrb.mxu0 %v220_v12  ;;  %410 = vmatpush.msrb.mxu3 %v1264_v41 }
  0x40   :  { %343 = vmatpush.msrb.mxu1 %v252_v13  ;;  %391 = vmatpush.msrb.mxu2 %v1306_v53 }
  0x41   :  { %324 = vmatpush.msrb.mxu0 %v218_v14  ;;  %411 = vmatpush.msrb.mxu3 %v1273_v42  ;;  %v271_v14 = vperm.slane %v269_v8, 0 }
  0x42   :  { %344 = vmatpush.msrb.mxu1 %v250_v15  ;;  %392 = vmatpush.msrb.mxu2 %v1320_v55 }
  0x43   :  { %325 = vmatpush.msrb.mxu0 %v216_v16  ;;  %412 = vmatpush.msrb.mxu3 %v1282_v43 }
  0x44   :  { %345 = vmatpush.msrb.mxu1 %v248_v17  ;;  %393 = vmatpush.msrb.mxu2 %v1334_v57 }
  0x45   :  { %326 = vmatpush.msrb.mxu0 %v214_v18  ;;  %413 = vmatpush.msrb.mxu3 %v1299_v52 }
  0x46   :  { %346 = vmatpush.msrb.mxu1 %v246_v19  ;;  %394 = vmatpush.msrb.mxu2 %v1348_v59 }
  0x47   :  { %327 = vmatpush.msrb.mxu0 %v212_v20  ;;  %414 = vmatpush.msrb.mxu3 %v1311_v54 }
  0x48   :  { %347 = vmatpush.msrb.mxu1 %v244_v21  ;;  %395 = vmatpush.msrb.mxu2 %v1362_v61 }
  0x49   :  { %328 = vmatpush.msrb.mxu0 %v210_v22  ;;  %415 = vmatpush.msrb.mxu3 %v1325_v56 }
  0x4a   :  { %348 = vmatpush.msrb.mxu1 %v242_v26  ;;  %396 = vmatpush.msrb.mxu2 %v1376_v63 }
  0x4b   :  { %329 = vmatpush.msrb.mxu0 %v208_v25  ;;  %416 = vmatpush.msrb.mxu3 %v1339_v58 }
  0x4c   :  { %349 = vmatpush.msrb.mxu1 %v240_v30  ;;  %397 = vmatpush.msrb.mxu2 %v1390_v1 }
  0x4d   :  { %330 = vmatpush.msrb.mxu0 %v206_v29  ;;  %417 = vmatpush.msrb.mxu3 %v1353_v60 }
  0x4e   :  { %350 = vmatpush.msrb.mxu1 %v238_v32  ;;  %398 = vmatpush.msrb.mxu2 %v1404_v3 }
  0x4f   :  { %427 = vmatpush.msra.mxu0 %v1225_v35  ;;  %418 = vmatpush.msrb.mxu3 %v1367_v62 }
  0x50   :  { %447 = vmatpush.msra.mxu1 %v1214_v33  ;;  %399 = vmatpush.msrb.mxu2 %v1418_v5 }
  0x51   :  { %428 = vmatpush.msra.mxu0 %v1230_v36  ;;  %419 = vmatpush.msrb.mxu3 %v1381_v0 }
  0x52   :  { %448 = vmatpush.msra.mxu1 %v1219_v34  ;;  %400 = vmatpush.msrb.mxu2 %v1426_v6 }
  0x53   :  { %429 = vmatpush.msra.mxu0 %v1244_v38  ;;  %420 = vmatpush.msrb.mxu3 %v1395_v2 }
  0x54   :  { %449 = vmatpush.msra.mxu1 %v1236_v37  ;;  %401 = vmatpush.msrb.mxu2 %v1432_v7 }
  0x55   :  { %430 = vmatpush.msra.mxu0 %v1258_v40  ;;  %421 = vmatpush.msrb.mxu3 %v1409_v4 }
  0x56   :  { %450 = vmatpush.msra.mxu1 %v1250_v39 }
  0x57   :  { %431 = vmatpush.msra.mxu0 %v1294_v51 }
  0x58   :  { %451 = vmatpush.msra.mxu1 %v1264_v41 }
  0x59   :  { %432 = vmatpush.msra.mxu0 %v1306_v53 }
  0x5a   :  { %452 = vmatpush.msra.mxu1 %v1273_v42 }
  0x5b   :  { %433 = vmatpush.msra.mxu0 %v1320_v55 }
  0x5c   :  { %453 = vmatpush.msra.mxu1 %v1282_v43 }
  0x5d   :  { %434 = vmatpush.msra.mxu0 %v1334_v57 }
  0x5e   :  { %454 = vmatpush.msra.mxu1 %v1299_v52 }
  0x5f   :  { %435 = vmatpush.msra.mxu0 %v1348_v59 }
  0x60   :  { %455 = vmatpush.msra.mxu1 %v1311_v54 }
  0x61   :  { %436 = vmatpush.msra.mxu0 %v1362_v61 }
  0x62   :  { %456 = vmatpush.msra.mxu1 %v1325_v56 }
  0x63   :  { %437 = vmatpush.msra.mxu0 %v1376_v63 }
  0x64   :  { %457 = vmatpush.msra.mxu1 %v1339_v58 }
  0x65   :  { %438 = vmatpush.msra.mxu0 %v1390_v1 }
  0x66   :  { %458 = vmatpush.msra.mxu1 %v1353_v60 }
  0x67   :  { %439 = vmatpush.msra.mxu0 %v1404_v3 }
  0x68   :  { %459 = vmatpush.msra.mxu1 %v1367_v62 }
  0x69   :  { %440 = vmatpush.msra.mxu0 %v1418_v5 }
  0x6a   :  { %460 = vmatpush.msra.mxu1 %v1381_v0 }
  0x6b   :  { %441 = vmatpush.msra.mxu0 %v1426_v6 }
  0x6c   :  { %461 = vmatpush.msra.mxu1 %v1395_v2 }
  0x6d   :  { %442 = vmatpush.msra.mxu0 %v1432_v7 }
  0x6e   :  { %462 = vmatpush.msra.mxu1 %v1409_v4 }
  0xab   :  { %v182_v47 = vpop.f32.mrf.mxu0 }
  0xac   :  { %v202_v48 = vpop.f32.mrf.mxu1  ;;  %v183_v49 = vadd.f32 %v182_v47, %v161_v45 }
  0xad   :  { %v203_v50 = vadd.f32 %v202_v48, %v162_v46 }
  0xae   :  { %291 = vmatmul.f32.vlgmr.msra.gmra.mxu2 %v183_v49  ;;  %331 = vmatmul.f32.vlgmr.msrb.gmra.mxu0 %v183_v49 }
  0xaf   :  { %311 = vmatmul.f32.vlgmr.msra.gmra.mxu3 %v203_v50  ;;  %351 = vmatmul.f32.vlgmr.msrb.gmra.mxu1 %v203_v50 }
 0x12b   :  { %v332_v10 = vpop.f32.mrf.mxu0 }
 0x12c   :  { %v333_v11 = vadd.f32 %v332_v10, %v272_v9  ;;  %v352_v12 = vpop.f32.mrf.mxu1 }
 0x12e   :  { %v1441_v13 = vadd.f32 %v352_v12, %v333_v11 }
 0x130   :  { %v363_v15 = vsel %vm355_vm0, %v1441_v13, 0.0  ;;  %v371_v16 = vmul.f32 %v1441_v13, %v1441_v13 }
 0x131   :  { %v364_v17 = vrot.slane %v363_v15, 4  ;;  %v292_v18 = vpop.f32.mrf.mxu2 }
 0x132   :  { %v379_v19 = vsel %vm355_vm0, %v371_v16, 0.0  ;;  %v293_v20 = vadd.f32 %v292_v18, %v271_v14  ;;  %v312_v21 = vpop.f32.mrf.mxu3 }
 0x133   :  { %v365_v22 = vadd.f32 %v364_v17, %v363_v15  ;;  %v380_v23 = vrot.slane %v379_v19, 4 }
 0x134   :  { %v1448_v24 = vadd.f32 %v312_v21, %v293_v20 }
 0x135   :  { %v381_v25 = vadd.f32 %v380_v23, %v379_v19  ;;  %v366_v26 = vrot.slane %v365_v22, 2 }
 0x136   :  { %v356_v27 = vsel %vm355_vm0, %v1448_v24, 0.0  ;;  %v370_v28 = vmul.f32 %v1448_v24, %v1448_v24 }
 0x137   :  { %v382_v29 = vrot.slane %v381_v25, 2  ;;  %v357_v30 = vrot.slane %v356_v27, 4  ;;  %v367_v31 = vadd.f32 %v366_v26, %v365_v22 }
 0x138   :  { %v372_v32 = vsel %vm355_vm0, %v370_v28, 0.0 }
 0x139   :  { %v358_v44 = vadd.f32 %v357_v30, %v356_v27  ;;  %v373_v45 = vrot.slane %v372_v32, 4  ;;  %v368_v46 = vrot.slane %v367_v31, 1  ;;  %v383_v47 = vadd.f32 %v382_v29, %v381_v25 }
 0x13b   :  { %v374_v48 = vadd.f32 %v373_v45, %v372_v32  ;;  %v369_v49 = vadd.f32 %v368_v46, %v367_v31  ;;  %v384_v50 = vrot.slane %v383_v47, 1  ;;  %v359_v8 = vrot.slane %v358_v44, 2  ;;  %v470_v46 = vld [vmem:[%s1605_s5] sm:$0x1]  ;;  %s1026_s5 = smov 32  }
 0x13d   :  { %v375_v9 = vrot.slane %v374_v48, 2  ;;  %422 = vmatmul.f32.vlgmr.msrb.gmra.mxu3 %v369_v49  ;;  %v385_v10 = vadd.f32 %v384_v50, %v383_v47  ;;  %v360_v11 = vadd.f32 %v359_v8, %v358_v44  ;;  %v483_v50 = vld [vmem:[%s1606_s6] sm:$0x1] }
 0x13f   :  { %463 = vmatmul.f32.vlgmr.msra.gmra.mxu1 %v385_v10  ;;  %v361_v12 = vrot.slane %v360_v11, 1  ;;  %v376_v14 = vadd.f32 %v375_v9, %v374_v48 }
 0x141   :  { %v362_v15 = vadd.f32 %v361_v12, %v360_v11  ;;  %v377_v16 = vrot.slane %v376_v14, 1  ;;  %v555_v12 = vld [vmem:[#allocation4 + $0xf0] sm:$0xff] }
 0x142   :  { %595 = vmatpush.msra.mxu2 %v555_v12  ;;  %v541_v12 = vld [vmem:[#allocation4 + $0x80] sm:$0xff] }
 0x143   :  { %402 = vmatmul.f32.vlgmr.msrb.gmra.mxu2 %v362_v15  ;;  %v378_v17 = vadd.f32 %v377_v16, %v376_v14  ;;  %v587_v14 = vld [vmem:[#allocation4 + $0x1f0] sm:$0xff]  ;;  %v556_v15 = vld [vmem:[#allocation4 + $0xf8] sm:$0xff] }
 0x144   :  { %615 = vmatpush.msra.mxu3 %v587_v14  ;;  %v588_v16 = vld [vmem:[#allocation4 + $0x1f8] sm:$0xff]  ;;  %635 = vmatpush.msrb.mxu0 %v556_v15  ;;  %v573_v14 = vld [vmem:[#allocation4 + $0x180] sm:$0xff]  ;;  %v542_v15 = vld [vmem:[#allocation4 + $0x88] sm:$0xff] }
 0x145   :  { %443 = vmatmul.f32.vlgmr.msra.gmra.mxu0 %v378_v17  ;;  %655 = vmatpush.msrb.mxu1 %v588_v16  ;;  %v553_v17 = vld [vmem:[#allocation4 + $0xe0] sm:$0xff]  ;;  %v574_v16 = vld [vmem:[#allocation4 + $0x188] sm:$0xff] }
 0x146   :  { %596 = vmatpush.msra.mxu2 %v553_v17  ;;  %v539_v17 = vld [vmem:[#allocation4 + $0x70] sm:$0xff] }
 0x1bc   :  { %v464_v19 = vpop.f32.mrf.mxu1 }
 0x1c0   :  { %v423_v20 = vpop.f32.mrf.mxu3 }
 0x1c2   :  { %v444_v18 = vpop.f32.mrf.mxu0 }
 0x1c3   :  { %v465_v22 = vadd.f32 %v464_v19, %v444_v18  ;;  %v585_v18 = vld [vmem:[#allocation4 + $0x1e0] sm:$0xff]  ;;  %v554_v19 = vld [vmem:[#allocation4 + $0xe8] sm:$0xff] }
 0x1c4   :  { %616 = vmatpush.msra.mxu3 %v585_v18  ;;  %636 = vmatpush.msrb.mxu0 %v554_v19  ;;  %v571_v18 = vld [vmem:[#allocation4 + $0x170] sm:$0xff]  ;;  %v540_v19 = vld [vmem:[#allocation4 + $0x78] sm:$0xff] }
 0x1c5   :  { %v467_v26 = vmul.f32 0.0625, %v465_v22  ;;  %v583_v22 = vld [vmem:[#allocation4 + $0x1d0] sm:$0xff] }
 0x1c6   :  { %v403_v21 = vpop.f32.mrf.mxu2  ;;  %617 = vmatpush.msra.mxu3 %v583_v22  ;;  %v569_v22 = vld [vmem:[#allocation4 + $0x160] sm:$0xff] }
 0x1c7   :  { %v424_v23 = vadd.f32 %v423_v20, %v403_v21  ;;  %v586_v20 = vld [vmem:[#allocation4 + $0x1e8] sm:$0xff]  ;;  %v551_v21 = vld [vmem:[#allocation4 + $0xd0] sm:$0xff] }
 0x1c8   :  { %656 = vmatpush.msrb.mxu1 %v586_v20  ;;  %597 = vmatpush.msra.mxu2 %v551_v21  ;;  %v572_v20 = vld [vmem:[#allocation4 + $0x178] sm:$0xff]  ;;  %v537_v21 = vld [vmem:[#allocation4 + $0x60] sm:$0xff] }
 0x1c9   :  { %v426_v25 = vmul.f32 0.0625, %v424_v23  ;;  %v552_v23 = vld [vmem:[#allocation4 + $0xd8] sm:$0xff] }
 0x1ca   :  { %637 = vmatpush.msrb.mxu0 %v552_v23  ;;  %v538_v23 = vld [vmem:[#allocation4 + $0x68] sm:$0xff] }
 0x1cb   :  { %v468_v27 = vmul.f32 %v426_v25, %v426_v25 }
 0x1cd   :  { %v469_v28 = vsub.f32 %v467_v26, %v468_v27  ;;  %v549_v26 = vld [vmem:[#allocation4 + $0xc0] sm:$0xff] }
 0x1ce   :  { %v581_v27 = vld [vmem:[#allocation4 + $0x1c0] sm:$0xff]  ;;  %598 = vmatpush.msra.mxu2 %v549_v26  ;;  %v535_v26 = vld [vmem:[#allocation4 + $0x50] sm:$0xff] }
 0x1cf   :  { %v471_v29 = vadd.f32 1e-05, %v469_v28  ;;  %v550_v28 = vld [vmem:[#allocation4 + $0xc8] sm:$0xff]  ;;  %618 = vmatpush.msra.mxu3 %v581_v27  ;;  %v567_v27 = vld [vmem:[#allocation4 + $0x150] sm:$0xff] }
 0x1d0   :  { %638 = vmatpush.msrb.mxu0 %v550_v28  ;;  %v536_v28 = vld [vmem:[#allocation4 + $0x58] sm:$0xff] }
 0x1d1   :  { %936 = vrsqrt.f32 %v471_v29  ;;  %vm478_vm2 = vweird.f32 %v471_v29 }
 0x1d7   :  { %v937_v30 = vpop.eup %936 }
 0x1d8   :  { %v473_v31 = vmul.f32 %v937_v30, %v471_v29  ;;  %vm479_vm1 = vweird.f32 %v937_v30  ;;  %v582_v29 = vld [vmem:[#allocation4 + $0x1c8] sm:$0xff] }
 0x1d9   :  { %vm480_vm3 = vmor %vm478_vm2, %vm479_vm1 }
 0x1da   :  { %v474_v32 = vmul.f32 %v937_v30, %v473_v31  ;;  %v579_v31 = vld [vmem:[#allocation4 + $0x1b0] sm:$0xff] }
 0x1db   :  { %619 = vmatpush.msra.mxu3 %v579_v31  ;;  %v565_v31 = vld [vmem:[#allocation4 + $0x140] sm:$0xff] }
 0x1dc   :  { %v475_v44 = vmul.f32 0.5, %v474_v32  ;;  %v548_v32 = vld [vmem:[#allocation4 + $0xb8] sm:$0xff] }
 0x1dd   :  { %639 = vmatpush.msrb.mxu0 %v548_v32  ;;  %v534_v32 = vld [vmem:[#allocation4 + $0x48] sm:$0xff] }
 0x1de   :  { %v476_v45 = vsub.f32 1.5, %v475_v44  ;;  %v580_v44 = vld [vmem:[#allocation4 + $0x1b8] sm:$0xff] }
 0x1e0   :  { %v477_v47 = vmul.f32 %v937_v30, %v476_v45  ;;  %v545_v45 = vld [vmem:[#allocation4 + $0xa0] sm:$0xff] }
 0x1e2   :  { %v481_v48 = vsel %vm480_vm3, %v937_v30, %v477_v47  ;;  %v547_v30 = vld [vmem:[#allocation4 + $0xb0] sm:$0xff]  ;;  %v546_v47 = vld [vmem:[#allocation4 + $0xa8] sm:$0xff] }
 0x1e3   :  { %v1458_v49 = vmul.f32 %v481_v48, %v470_v46  ;;  %v577_v46 = vld [vmem:[#allocation4 + $0x1a0] sm:$0xff]  ;;  %599 = vmatpush.msra.mxu2 %v547_v30  ;;  %v578_v48 = vld [vmem:[#allocation4 + $0x1a8] sm:$0xff]  ;;  %640 = vmatpush.msrb.mxu0 %v546_v47  ;;  %v532_v47 = vld [vmem:[#allocation4 + $0x38] sm:$0xff] }
 0x1e4   :  { %620 = vmatpush.msra.mxu3 %v577_v46  ;;  %v533_v30 = vld [vmem:[#allocation4 + $0x40] sm:$0xff]  ;;  %v563_v46 = vld [vmem:[#allocation4 + $0x130] sm:$0xff] }
 0x1e5   :  { %v484_v8 = vmul.f32 %v1458_v49, %v426_v25  ;;  %v487_v9 = vperm.slane %v1458_v49, 0  ;;  %v584_v25 = vld [vmem:[#allocation4 + $0x1d8] sm:$0xff]  ;;  %600 = vmatpush.msra.mxu2 %v545_v45  ;;  %v531_v45 = vld [vmem:[#allocation4 + $0x30] sm:$0xff] }
 0x1e6   :  { %657 = vmatpush.msrb.mxu1 %v584_v25  ;;  %v570_v25 = vld [vmem:[#allocation4 + $0x168] sm:$0xff] }
 0x1e7   :  { %v1465_v10 = vsub.f32 %v483_v50, %v484_v8  ;;  %494 = vrot.lane.b32.xlu1 %v487_v9, %s1025_s25  ;;  %488 = vrot.lane.b32.xlu0 %v487_v9, %s1026_s5  ;;  %v543_v50 = vld [vmem:[#allocation4 + $0x90] sm:$0xff] }
 0x1e8   :  { %658 = vmatpush.msrb.mxu1 %v582_v29  ;;  %v575_v8 = vld [vmem:[#allocation4 + $0x190] sm:$0xff]  ;;  %601 = vmatpush.msra.mxu2 %v543_v50  ;;  %v568_v29 = vld [vmem:[#allocation4 + $0x158] sm:$0xff]  ;;  %v529_v50 = vld [vmem:[#allocation4 + $0x20] sm:$0xff] }
 0x1e9   :  { %v504_v11 = vperm.slane %v1465_v10, 0  ;;  %621 = vmatpush.msra.mxu3 %v575_v8  ;;  %v561_v8 = vld [vmem:[#allocation4 + $0x120] sm:$0xff] }
 0x1ea   :  { %659 = vmatpush.msrb.mxu1 %v580_v44  ;;  %602 = vmatpush.msra.mxu2 %v541_v12  ;;  %v566_v44 = vld [vmem:[#allocation4 + $0x148] sm:$0xff]  ;;  %v527_v12 = vld [vmem:[#allocation4 + $0x10] sm:$0xff] }
 0x1eb   :  { %508 = vrot.lane.b32.xlu2 %v504_v11, %s1027_s26  ;;  %622 = vmatpush.msra.mxu3 %v573_v14  ;;  %v559_v14 = vld [vmem:[#allocation4 + $0x110] sm:$0xff] }
 0x1ec   :  { %660 = vmatpush.msrb.mxu1 %v578_v48  ;;  %603 = vmatpush.msra.mxu2 %v539_v17  ;;  %v564_v48 = vld [vmem:[#allocation4 + $0x138] sm:$0xff]  ;;  %v525_v17 = vld [vmem:[#allocation4] sm:$0xff] }
 0x1ed   :  { %623 = vmatpush.msra.mxu3 %v571_v18  ;;  %v557_v18 = vld [vmem:[#allocation4 + $0x100] sm:$0xff] }
 0x1ee   :  { %604 = vmatpush.msra.mxu2 %v537_v21 }
 0x1ef   :  { %491 = vrot.lane.b32.xlu0 %v487_v9, %s1027_s26  ;;  %505 = vrot.lane.b32.xlu1 %v504_v11, %s1026_s5  ;;  %v544_v9 = vld [vmem:[#allocation4 + $0x98] sm:$0xff] }
 0x1f0   :  { %641 = vmatpush.msrb.mxu0 %v544_v9  ;;  %624 = vmatpush.msra.mxu3 %v569_v22  ;;  %v530_v9 = vld [vmem:[#allocation4 + $0x28] sm:$0xff] }
 0x1f1   :  { %605 = vmatpush.msra.mxu2 %v535_v26 }
 0x1f2   :  { %642 = vmatpush.msrb.mxu0 %v542_v15  ;;  %625 = vmatpush.msra.mxu3 %v567_v27  ;;  %v528_v15 = vld [vmem:[#allocation4 + $0x18] sm:$0xff] }
 0x1f3   :  { %511 = vrot.lane.b32.xlu2 %v504_v11, %s1025_s25  ;;  %v576_v11 = vld [vmem:[#allocation4 + $0x198] sm:$0xff]  ;;  %606 = vmatpush.msra.mxu2 %v533_v30 }
 0x1f4   :  { %661 = vmatpush.msrb.mxu1 %v576_v11  ;;  %643 = vmatpush.msrb.mxu0 %v540_v19  ;;  %v562_v11 = vld [vmem:[#allocation4 + $0x128] sm:$0xff] }
 0x1f5   :  { %626 = vmatpush.msra.mxu3 %v565_v31  ;;  %607 = vmatpush.msra.mxu2 %v531_v45  ;;  %v526_v19 = vld [vmem:[#allocation4 + $0x8] sm:$0xff] }
 0x1f6   :  { %662 = vmatpush.msrb.mxu1 %v574_v16  ;;  %644 = vmatpush.msrb.mxu0 %v538_v23  ;;  %v560_v16 = vld [vmem:[#allocation4 + $0x118] sm:$0xff] }
 0x1f7   :  { %627 = vmatpush.msra.mxu3 %v563_v46  ;;  %608 = vmatpush.msra.mxu2 %v529_v50 }
 0x1f8   :  { %663 = vmatpush.msrb.mxu1 %v572_v20  ;;  %645 = vmatpush.msrb.mxu0 %v536_v28  ;;  %v558_v20 = vld [vmem:[#allocation4 + $0x108] sm:$0xff] }
 0x1f9   :  { %628 = vmatpush.msra.mxu3 %v561_v8  ;;  %609 = vmatpush.msra.mxu2 %v527_v12 }
 0x1fa   :  { %664 = vmatpush.msrb.mxu1 %v570_v25  ;;  %646 = vmatpush.msrb.mxu0 %v534_v32 }
 0x1fb   :  { %629 = vmatpush.msra.mxu3 %v559_v14  ;;  %610 = vmatpush.msra.mxu2 %v525_v17 }
 0x1fc   :  { %665 = vmatpush.msrb.mxu1 %v568_v29  ;;  %647 = vmatpush.msrb.mxu0 %v532_v47 }
 0x1fd   :  { %630 = vmatpush.msra.mxu3 %v557_v18  ;;  %705 = vmatpush.msrb.mxu2 %v1225_v35 }
 0x1fe   :  { %666 = vmatpush.msrb.mxu1 %v566_v44  ;;  %648 = vmatpush.msrb.mxu0 %v530_v9 }
 0x1ff   :  { %725 = vmatpush.msrb.mxu3 %v1214_v33  ;;  %706 = vmatpush.msrb.mxu2 %v1230_v36 }
 0x200   :  { %667 = vmatpush.msrb.mxu1 %v564_v48  ;;  %649 = vmatpush.msrb.mxu0 %v528_v15 }
 0x201   :  { %726 = vmatpush.msrb.mxu3 %v1219_v34  ;;  %707 = vmatpush.msrb.mxu2 %v1244_v38 }
 0x202   :  { %668 = vmatpush.msrb.mxu1 %v562_v11  ;;  %650 = vmatpush.msrb.mxu0 %v526_v19 }
 0x203   :  { %727 = vmatpush.msrb.mxu3 %v1236_v37  ;;  %708 = vmatpush.msrb.mxu2 %v1258_v40 }
 0x204   :  { %669 = vmatpush.msrb.mxu1 %v560_v16  ;;  %746 = vmatpush.msra.mxu0 %v1225_v35 }
 0x205   :  { %728 = vmatpush.msrb.mxu3 %v1250_v39  ;;  %709 = vmatpush.msrb.mxu2 %v1294_v51 }
 0x206   :  { %670 = vmatpush.msrb.mxu1 %v558_v20  ;;  %747 = vmatpush.msra.mxu0 %v1230_v36 }
 0x207   :  { %729 = vmatpush.msrb.mxu3 %v1264_v41  ;;  %710 = vmatpush.msrb.mxu2 %v1306_v53 }
 0x208   :  { %766 = vmatpush.msra.mxu1 %v1214_v33  ;;  %748 = vmatpush.msra.mxu0 %v1244_v38 }
 0x209   :  { %730 = vmatpush.msrb.mxu3 %v1273_v42  ;;  %711 = vmatpush.msrb.mxu2 %v1320_v55 }
 0x20a   :  { %767 = vmatpush.msra.mxu1 %v1219_v34  ;;  %749 = vmatpush.msra.mxu0 %v1258_v40 }
 0x20b   :  { %731 = vmatpush.msrb.mxu3 %v1282_v43  ;;  %712 = vmatpush.msrb.mxu2 %v1334_v57 }
 0x20c   :  { %768 = vmatpush.msra.mxu1 %v1236_v37  ;;  %750 = vmatpush.msra.mxu0 %v1294_v51 }
 0x20d   :  { %732 = vmatpush.msrb.mxu3 %v1299_v52  ;;  %713 = vmatpush.msrb.mxu2 %v1348_v59 }
 0x20e   :  { %769 = vmatpush.msra.mxu1 %v1250_v39  ;;  %751 = vmatpush.msra.mxu0 %v1306_v53 }
 0x20f   :  { %733 = vmatpush.msrb.mxu3 %v1311_v54  ;;  %714 = vmatpush.msrb.mxu2 %v1362_v61 }
 0x210   :  { %770 = vmatpush.msra.mxu1 %v1264_v41  ;;  %752 = vmatpush.msra.mxu0 %v1320_v55 }
 0x211   :  { %734 = vmatpush.msrb.mxu3 %v1325_v56  ;;  %715 = vmatpush.msrb.mxu2 %v1376_v63 }
 0x212   :  { %771 = vmatpush.msra.mxu1 %v1273_v42  ;;  %753 = vmatpush.msra.mxu0 %v1334_v57 }
 0x213   :  { %735 = vmatpush.msrb.mxu3 %v1339_v58  ;;  %716 = vmatpush.msrb.mxu2 %v1390_v1 }
 0x214   :  { %772 = vmatpush.msra.mxu1 %v1282_v43  ;;  %754 = vmatpush.msra.mxu0 %v1348_v59 }
 0x215   :  { %736 = vmatpush.msrb.mxu3 %v1353_v60  ;;  %717 = vmatpush.msrb.mxu2 %v1404_v3 }
 0x216   :  { %773 = vmatpush.msra.mxu1 %v1299_v52  ;;  %755 = vmatpush.msra.mxu0 %v1362_v61 }
 0x217   :  { %737 = vmatpush.msrb.mxu3 %v1367_v62  ;;  %718 = vmatpush.msrb.mxu2 %v1418_v5 }
 0x218   :  { %774 = vmatpush.msra.mxu1 %v1311_v54  ;;  %756 = vmatpush.msra.mxu0 %v1376_v63 }
 0x219   :  { %738 = vmatpush.msrb.mxu3 %v1381_v0  ;;  %719 = vmatpush.msrb.mxu2 %v1426_v6 }
 0x21a   :  { %775 = vmatpush.msra.mxu1 %v1325_v56  ;;  %757 = vmatpush.msra.mxu0 %v1390_v1 }
 0x21b   :  { %739 = vmatpush.msrb.mxu3 %v1395_v2  ;;  %720 = vmatpush.msrb.mxu2 %v1432_v7 }
 0x21c   :  { %776 = vmatpush.msra.mxu1 %v1339_v58  ;;  %758 = vmatpush.msra.mxu0 %v1404_v3 }
 0x21d   :  { %740 = vmatpush.msrb.mxu3 %v1409_v4 }
 0x21e   :  { %777 = vmatpush.msra.mxu1 %v1353_v60  ;;  %759 = vmatpush.msra.mxu0 %v1418_v5  ;;  %v589_v60 = vld [vmem:[%s1608_s8] sm:$0x3] }
 0x21f   :  { %v592_v61 = vperm.slane %v589_v60, 1  ;;  %v591_v1 = vperm.slane %v589_v60, 0 }
 0x220   :  { %778 = vmatpush.msra.mxu1 %v1367_v62  ;;  %760 = vmatpush.msra.mxu0 %v1426_v6 }
 0x222   :  { %779 = vmatpush.msra.mxu1 %v1381_v0  ;;  %761 = vmatpush.msra.mxu0 %v1432_v7 }
 0x224   :  { %780 = vmatpush.msra.mxu1 %v1395_v2 }
 0x226   :  { %781 = vmatpush.msra.mxu1 %v1409_v4 }
 0x245   :  { %v509_v33 = vpop.permute.xlu2 %508 }
 0x24d   :  { %v512_v41 = vpop.permute.xlu2 %511 }
 0x259   :  { %v495_v34 = vpop.permute.xlu1 %494  ;;  %v489_v35 = vpop.permute.xlu0 %488 }
 0x25a   :  { %v498_v36 = vsel %vm497_vm4, %v1458_v49, %v489_v35 }
 0x261   :  { %v492_v37 = vpop.permute.xlu0 %491  ;;  %v506_v38 = vpop.permute.xlu1 %505 }
 0x262   :  { %v500_v39 = vsel %vm499_vm5, %v498_v36, %v492_v37  ;;  %v514_v40 = vsel %vm497_vm4, %v1465_v10, %v506_v38 }
 0x263   :  { %v502_v42 = vsel %vm501_vm6, %v500_v39, %v495_v34  ;;  %v515_v43 = vsel %vm499_vm5, %v514_v40, %v509_v33 }
 0x264   :  { %v517_v51 = vperm.slane %v502_v42, 0  ;;  %v516_v52 = vsel %vm501_vm6, %v515_v43, %v512_v41 }
 0x265   :  { %v520_v53 = vperm.slane %v516_v52, 0 }
 0x266   :  { %v518_v54 = vmul.f32 %v517_v51, %v1448_v24  ;;  %v519_v55 = vmul.f32 %v517_v51, %v1441_v13 }
 0x268   :  { %v521_v56 = vadd.f32 %v520_v53, %v518_v54  ;;  %v522_v57 = vadd.f32 %v520_v53, %v519_v55  ;;  %v789_v53 = vld [vmem:[%s1609_s9] sm:$0x1] }
 0x26a   :  { %v523_v58 = vmax.f32 %v521_v56, 0.0  ;;  %v524_v59 = vmax.f32 %v522_v57, 0.0 }
 0x26c   :  { %611 = vmatmul.f32.vlgmr.msra.gmra.mxu2 %v523_v58  ;;  %631 = vmatmul.f32.vlgmr.msra.gmra.mxu3 %v524_v59 }
 0x26d   :  { %651 = vmatmul.f32.vlgmr.msrb.gmra.mxu0 %v523_v58  ;;  %671 = vmatmul.f32.vlgmr.msrb.gmra.mxu1 %v524_v59  ;;  %v802_v59 = vld [vmem:[%s1610_s10] sm:$0x1] }
 0x2ea   :  { %v652_v62 = vpop.f32.mrf.mxu0  ;;  %v672_v0 = vpop.f32.mrf.mxu1 }
 0x2eb   :  { %v653_v63 = vadd.f32 %v652_v62, %v592_v61  ;;  %v856_v62 = vld [vmem:[#allocation6 + $0x78] sm:$0xff] }
 0x2ec   :  { %877 = vmatpush.msra.mxu2 %v856_v62 }
 0x2ed   :  { %v1551_v2 = vadd.f32 %v672_v0, %v653_v63  ;;  %v872_v63 = vld [vmem:[#allocation6 + $0xf8] sm:$0xff]  ;;  %v855_v0 = vld [vmem:[#allocation6 + $0x70] sm:$0xff] }
 0x2ee   :  { %897 = vmatpush.msra.mxu3 %v872_v63  ;;  %878 = vmatpush.msra.mxu2 %v855_v0 }
 0x2ef   :  { %v682_v3 = vsel %vm355_vm0, %v1551_v2, 0.0  ;;  %v690_v4 = vmul.f32 %v1551_v2, %v1551_v2  ;;  %v612_v5 = vpop.f32.mrf.mxu2  ;;  %v632_v24 = vpop.f32.mrf.mxu3 }
 0x2f0   :  { %v683_v6 = vrot.slane %v682_v3, 4  ;;  %v613_v7 = vadd.f32 %v612_v5, %v591_v1  ;;  %v871_v1 = vld [vmem:[#allocation6 + $0xf0] sm:$0xff]  ;;  %v853_v5 = vld [vmem:[#allocation6 + $0x60] sm:$0xff] }
 0x2f1   :  { %v698_v13 = vsel %vm355_vm0, %v690_v4, 0.0  ;;  %v870_v4 = vld [vmem:[#allocation6 + $0xe8] sm:$0xff]  ;;  %898 = vmatpush.msra.mxu3 %v871_v1 }
 0x2f2   :  { %v684_v49 = vadd.f32 %v683_v6, %v682_v3  ;;  %v699_v10 = vrot.slane %v698_v13, 4  ;;  %v1558_v21 = vadd.f32 %v632_v24, %v613_v7  ;;  %v854_v3 = vld [vmem:[#allocation6 + $0x68] sm:$0xff]  ;;  %v869_v6 = vld [vmem:[#allocation6 + $0xe0] sm:$0xff]  ;;  %v852_v7 = vld [vmem:[#allocation6 + $0x58] sm:$0xff] }
 0x2f3   :  { %879 = vmatpush.msra.mxu2 %v854_v3  ;;  %899 = vmatpush.msra.mxu3 %v870_v4  ;;  %v851_v24 = vld [vmem:[#allocation6 + $0x50] sm:$0xff] }
 0x2f4   :  { %v685_v22 = vrot.slane %v684_v49, 2  ;;  %v700_v23 = vadd.f32 %v699_v10, %v698_v13  ;;  %v675_v25 = vsel %vm355_vm0, %v1558_v21, 0.0  ;;  %v689_v26 = vmul.f32 %v1558_v21, %v1558_v21  ;;  %v868_v13 = vld [vmem:[#allocation6 + $0xd8] sm:$0xff]  ;;  %v850_v10 = vld [vmem:[#allocation6 + $0x48] sm:$0xff] }
 0x2f5   :  { %v676_v27 = vrot.slane %v675_v25, 4  ;;  %880 = vmatpush.msra.mxu2 %v853_v5  ;;  %900 = vmatpush.msra.mxu3 %v869_v6 }
 0x2f6   :  { %v686_v28 = vadd.f32 %v685_v22, %v684_v49  ;;  %v701_v29 = vrot.slane %v700_v23, 2  ;;  %v691_v30 = vsel %vm355_vm0, %v689_v26, 0.0  ;;  %v867_v49 = vld [vmem:[#allocation6 + $0xd0] sm:$0xff]  ;;  %v866_v22 = vld [vmem:[#allocation6 + $0xc8] sm:$0xff]  ;;  %v848_v26 = vld [vmem:[#allocation6 + $0x38] sm:$0xff] }
 0x2f7   :  { %v677_v31 = vadd.f32 %v676_v27, %v675_v25  ;;  %v692_v32 = vrot.slane %v691_v30, 4  ;;  %881 = vmatpush.msra.mxu2 %v852_v7  ;;  %901 = vmatpush.msra.mxu3 %v868_v13  ;;  %v865_v25 = vld [vmem:[#allocation6 + $0xc0] sm:$0xff]  ;;  %v864_v27 = vld [vmem:[#allocation6 + $0xb8] sm:$0xff] }
 0x2f8   :  { %v687_v44 = vrot.slane %v686_v28, 1  ;;  %v702_v45 = vadd.f32 %v701_v29, %v700_v23  ;;  %v849_v23 = vld [vmem:[#allocation6 + $0x40] sm:$0xff]  ;;  %v863_v29 = vld [vmem:[#allocation6 + $0xb0] sm:$0xff] }
 0x2f9   :  { %v678_v46 = vrot.slane %v677_v31, 2  ;;  %v693_v47 = vadd.f32 %v692_v32, %v691_v30  ;;  %882 = vmatpush.msra.mxu2 %v851_v24  ;;  %902 = vmatpush.msra.mxu3 %v867_v49  ;;  %v846_v30 = vld [vmem:[#allocation6 + $0x28] sm:$0xff]  ;;  %v845_v32 = vld [vmem:[#allocation6 + $0x20] sm:$0xff] }
 0x2fa   :  { %v688_v48 = vadd.f32 %v687_v44, %v686_v28  ;;  %v703_v50 = vrot.slane %v702_v45, 1  ;;  %v847_v28 = vld [vmem:[#allocation6 + $0x30] sm:$0xff]  ;;  %v861_v44 = vld [vmem:[#allocation6 + $0xa0] sm:$0xff] }
 0x2fb   :  { %v679_v8 = vadd.f32 %v678_v46, %v677_v31  ;;  %v694_v9 = vrot.slane %v693_v47, 2  ;;  %883 = vmatpush.msra.mxu2 %v850_v10  ;;  %903 = vmatpush.msra.mxu3 %v866_v22  ;;  %v862_v31 = vld [vmem:[#allocation6 + $0xa8] sm:$0xff]  ;;  %v860_v46 = vld [vmem:[#allocation6 + $0x98] sm:$0xff] }
 0x2fc   :  { %741 = vmatmul.f32.vlgmr.msrb.gmra.mxu3 %v688_v48  ;;  %v704_v11 = vadd.f32 %v703_v50, %v702_v45  ;;  %v844_v45 = vld [vmem:[#allocation6 + $0x18] sm:$0xff]  ;;  %v859_v48 = vld [vmem:[#allocation6 + $0x90] sm:$0xff]  ;;  %v842_v50 = vld [vmem:[#allocation6 + $0x8] sm:$0xff] }
 0x2fd   :  { %v680_v12 = vrot.slane %v679_v8, 1  ;;  %v695_v14 = vadd.f32 %v694_v9, %v693_v47  ;;  %884 = vmatpush.msra.mxu2 %v849_v23  ;;  %904 = vmatpush.msra.mxu3 %v865_v25  ;;  %v843_v47 = vld [vmem:[#allocation6 + $0x10] sm:$0xff]  ;;  %v841_v9 = vld [vmem:[#allocation6] sm:$0xff] }
 0x2fe   :  { %782 = vmatmul.f32.vlgmr.msra.gmra.mxu1 %v704_v11  ;;  %v857_v11 = vld [vmem:[#allocation6 + $0x80] sm:$0xff] }
 0x2ff   :  { %v681_v15 = vadd.f32 %v680_v12, %v679_v8  ;;  %v696_v16 = vrot.slane %v695_v14, 1  ;;  %885 = vmatpush.msra.mxu2 %v848_v26  ;;  %905 = vmatpush.msra.mxu3 %v864_v27  ;;  %v858_v8 = vld [vmem:[#allocation6 + $0x88] sm:$0xff] }
 0x301   :  { %721 = vmatmul.f32.vlgmr.msrb.gmra.mxu2 %v681_v15  ;;  %v697_v17 = vadd.f32 %v696_v16, %v695_v14  ;;  %906 = vmatpush.msra.mxu3 %v863_v29 }
 0x302   :  { %886 = vmatpush.msra.mxu2 %v847_v28 }
 0x303   :  { %762 = vmatmul.f32.vlgmr.msra.gmra.mxu0 %v697_v17  ;;  %907 = vmatpush.msra.mxu3 %v862_v31 }
 0x304   :  { %887 = vmatpush.msra.mxu2 %v846_v30 }
 0x305   :  { %908 = vmatpush.msra.mxu3 %v861_v44 }
 0x306   :  { %888 = vmatpush.msra.mxu2 %v845_v32 }
 0x307   :  { %909 = vmatpush.msra.mxu3 %v860_v46 }
 0x308   :  { %889 = vmatpush.msra.mxu2 %v844_v45 }
 0x309   :  { %910 = vmatpush.msra.mxu3 %v859_v48 }
 0x30a   :  { %890 = vmatpush.msra.mxu2 %v843_v47 }
 0x30b   :  { %911 = vmatpush.msra.mxu3 %v858_v8 }
 0x30c   :  { %891 = vmatpush.msra.mxu2 %v842_v50 }
 0x30d   :  { %912 = vmatpush.msra.mxu3 %v857_v11 }
 0x30e   :  { %892 = vmatpush.msra.mxu2 %v841_v9 }
 0x37b   :  { %v783_v19 = vpop.f32.mrf.mxu1 }
 0x37f   :  { %v742_v20 = vpop.f32.mrf.mxu3 }
 0x380   :  { %v763_v18 = vpop.f32.mrf.mxu0 }
 0x381   :  { %v784_v34 = vadd.f32 %v783_v19, %v763_v18 }
 0x383   :  { %v786_v37 = vmul.f32 0.0625, %v784_v34 }
 0x384   :  { %v722_v33 = vpop.f32.mrf.mxu2 }
 0x385   :  { %v743_v35 = vadd.f32 %v742_v20, %v722_v33 }
 0x387   :  { %v745_v36 = vmul.f32 0.0625, %v743_v35 }
 0x389   :  { %v787_v38 = vmul.f32 %v745_v36, %v745_v36 }
 0x38b   :  { %v788_v39 = vsub.f32 %v786_v37, %v787_v38 }
 0x38d   :  { %v790_v40 = vadd.f32 1e-05, %v788_v39 }
 0x38f   :  { %938 = vrsqrt.f32 %v790_v40  ;;  %vm797_vm8 = vweird.f32 %v790_v40 }
 0x395   :  { %v939_v41 = vpop.eup %938 }
 0x396   :  { %v792_v42 = vmul.f32 %v939_v41, %v790_v40  ;;  %vm798_vm7 = vweird.f32 %v939_v41 }
 0x397   :  { %vm799_vm9 = vmor %vm797_vm8, %vm798_vm7 }
 0x398   :  { %v793_v43 = vmul.f32 %v939_v41, %v792_v42 }
 0x39a   :  { %v794_v51 = vmul.f32 0.5, %v793_v43 }
 0x39c   :  { %v795_v52 = vsub.f32 1.5, %v794_v51 }
 0x39e   :  { %v796_v54 = vmul.f32 %v939_v41, %v795_v52  ;;  %v935_v52 = vld [vmem:[%s1612_s12] ss:$0 sm:$0xff] }
 0x3a0   :  { %v800_v55 = vsel %vm799_vm9, %v939_v41, %v796_v54 }
 0x3a1   :  { %v1568_v56 = vmul.f32 %v800_v55, %v789_v53 }
 0x3a3   :  { %v803_v57 = vmul.f32 %v1568_v56, %v745_v36  ;;  %v806_v58 = vperm.slane %v1568_v56, 0 }
 0x3a5   :  { %813 = vrot.lane.b32.xlu2 %v806_v58, %s1025_s25  ;;  %810 = vrot.lane.b32.xlu1 %v806_v58, %s1027_s26  ;;  %v1578_v60 = vsub.f32 %v802_v59, %v803_v57 }
 0x3a6   :  { %807 = vrot.lane.b32.xlu0 %v806_v58, %s1026_s5 }
 0x3a7   :  { %v820_v61 = vperm.slane %v1578_v60, 0 }
 0x3ad   :  { %827 = vrot.lane.b32.xlu2 %v820_v61, %s1025_s25  ;;  %824 = vrot.lane.b32.xlu1 %v820_v61, %s1027_s26 }
 0x3ae   :  { %821 = vrot.lane.b32.xlu0 %v820_v61, %s1026_s5 }
 0x3ff   :  { %v814_v14 = vpop.permute.xlu2 %813 }
 0x407   :  { %v828_v35 = vpop.permute.xlu2 %827 }
 0x417   :  { %v811_v12 = vpop.permute.xlu1 %810 }
 0x418   :  { %v808_v15 = vpop.permute.xlu0 %807 }
 0x419   :  { %v816_v16 = vsel %vm497_vm4, %v1568_v56, %v808_v15 }
 0x41a   :  { %v817_v17 = vsel %vm499_vm5, %v816_v16, %v811_v12 }
 0x41b   :  { %v818_v18 = vsel %vm501_vm6, %v817_v17, %v814_v14 }
 0x41c   :  { %v833_v20 = vperm.slane %v818_v18, 0 }
 0x41e   :  { %v834_v38 = vmul.f32 %v833_v20, %v1558_v21  ;;  %v835_v39 = vmul.f32 %v833_v20, %v1551_v2 }
 0x41f   :  { %v825_v19 = vpop.permute.xlu1 %824 }
 0x420   :  { %v822_v33 = vpop.permute.xlu0 %821 }
 0x421   :  { %v830_v34 = vsel %vm497_vm4, %v1578_v60, %v822_v33 }
 0x422   :  { %v831_v36 = vsel %vm499_vm5, %v830_v34, %v825_v19 }
 0x423   :  { %v832_v37 = vsel %vm501_vm6, %v831_v36, %v828_v35 }
 0x424   :  { %v836_v40 = vperm.slane %v832_v37, 0 }
 0x426   :  { %v837_v41 = vadd.f32 %v836_v40, %v834_v38  ;;  %v838_v42 = vadd.f32 %v836_v40, %v835_v39 }
 0x428   :  { %v839_v43 = vmax.f32 %v837_v41, 0.0  ;;  %v840_v51 = vmax.f32 %v838_v42, 0.0 }
 0x42a   :  { %893 = vmatmul.f32.vlgmr.msra.gmra.mxu2 %v839_v43  ;;  %913 = vmatmul.f32.vlgmr.msra.gmra.mxu3 %v840_v51 }
 0x4ad   :  { %v894_v53 = vpop.f32.mrf.mxu2  ;;  %v914_v55 = vpop.f32.mrf.mxu3 }
 0x4ae   :  { %v895_v54 = vadd.f32 %v935_v52, %v894_v53 }
 0x4b0   :  { %v915_v56 = vadd.f32 %v914_v55, %v895_v54 }
 0x4b2   :  { %940 = vtanh.f32 %v915_v56 }
 0x4b8   :  { %v941_v57 = vpop.eup %940 }
 0x4b9   :  { %918 = vst [vmem:[%s1614_s14] sm:$0x3] %v941_v57 }
 0x4ba   :  { %923 = vsyncpa [#allocation3], 1 }
 0x4bb   :  { %924 = vsyncpa [#allocation5], 1 }

</bundles_post_ra>
